<compile_context>
chip_gen: v7x
topology: tpu7x:2x2x1
jax: 0.10.0
libtpu: 0.0.40
codegen_flags: <defaults>
</compile_context>

<pallas_src>
import functools
import math

import jax
import jax.numpy as jnp
from jax import lax
from jax.experimental import pallas as pl
from jax.experimental.pallas import tpu as pltpu


# ---------------------------------------------------------------------------
# Per-generation tuning (VMEM scoped limit + default row-tile)
# ---------------------------------------------------------------------------
def _device_kind():
    try:
        return jax.devices()[0].device_kind.lower()
    except Exception:
        return ""


_KIND = _device_kind()
if "v7" in _KIND:                                     # 64 MiB physical VMEM -> headroom
    VMEM_LIMIT = 48 * 1024 * 1024
    DEFAULT_TM = 512
elif any(g in _KIND for g in ("v4", "v5", "v6")):     # 128 MiB physical VMEM
    VMEM_LIMIT = 100 * 1024 * 1024
    DEFAULT_TM = 1024
else:                                                 # unknown: leave compiler defaults
    VMEM_LIMIT = None
    DEFAULT_TM = 512


def _cparams(*sem):
    return pltpu.CompilerParams(dimension_semantics=sem, vmem_limit_bytes=VMEM_LIMIT)


def _pick_tile(dim, target, multiple):
    """Largest tile <= target that divides dim and is a multiple of `multiple`;
    falls back to the full dim (always a legal BlockSpec block)."""
    if dim <= target:
        return dim
    t = (target // multiple) * multiple
    while t >= multiple:
        if dim % t == 0:
            return t
        t -= multiple
    return dim


# ---------------------------------------------------------------------------
# Linear:  activation(x @ w + b)   (no K grid axis: BERT-base K fits VMEM)
# ---------------------------------------------------------------------------
def _linear_kernel(x_ref, w_ref, b_ref, o_ref, *, activation):
    acc = jnp.dot(x_ref[...], w_ref[...], preferred_element_type=jnp.float32) + b_ref[...]
    if activation == "relu":
        acc = jnp.maximum(acc, 0.0)
    elif activation == "gelu":
        acc = jax.nn.gelu(acc, approximate=True)   # TODO(synk): exact erf GELU
    o_ref[...] = acc.astype(o_ref.dtype)


def pallas_linear(x, w, b, activation=None, out_dtype=jnp.bfloat16, tm=None, tn=2048):
    M, K = x.shape
    Kw, N = w.shape
    assert K == Kw
    tm = _pick_tile(M, tm or DEFAULT_TM, 8)
    tn = _pick_tile(N, tn, 128)
    return pl.pallas_call(
        functools.partial(_linear_kernel, activation=activation),
        out_shape=jax.ShapeDtypeStruct((M, N), out_dtype),
        grid=(M // tm, N // tn),
        in_specs=[
            pl.BlockSpec((tm, K), lambda i, j: (i, 0)),
            pl.BlockSpec((K, tn), lambda i, j: (0, j)),
            pl.BlockSpec((1, tn), lambda i, j: (0, j)),
        ],
        out_specs=pl.BlockSpec((tm, tn), lambda i, j: (i, j)),
        compiler_params=_cparams("parallel", "parallel"),
    )(x, w, b.reshape(1, N))


# ---------------------------------------------------------------------------
# LayerNorm (embedding LN); outputs the bf16 hidden stream
# ---------------------------------------------------------------------------
def _ln_kernel(x_ref, g_ref, b_ref, o_ref, *, eps):
    x = x_ref[...].astype(jnp.float32)
    mu = jnp.mean(x, axis=-1, keepdims=True)
    var = jnp.mean((x - mu) ** 2, axis=-1, keepdims=True)
    o_ref[...] = ((x - mu) * lax.rsqrt(var + eps) * g_ref[...] + b_ref[...]).astype(o_ref.dtype)


def pallas_layernorm(x, g, b, eps=1e-12, tm=None):
    M, H = x.shape
    tm = _pick_tile(M, tm or DEFAULT_TM, 8)
    return pl.pallas_call(
        functools.partial(_ln_kernel, eps=eps),
        out_shape=jax.ShapeDtypeStruct((M, H), jnp.bfloat16),
        grid=(M // tm,),
        in_specs=[
            pl.BlockSpec((tm, H), lambda i: (i, 0)),
            pl.BlockSpec((1, H), lambda i: (0, 0)),
            pl.BlockSpec((1, H), lambda i: (0, 0)),
        ],
        out_specs=pl.BlockSpec((tm, H), lambda i: (i, 0)),
        compiler_params=_cparams("parallel"),
    )(x, g, b)


# ---------------------------------------------------------------------------
# Attention: one (batch, head) per grid point; head split done via BlockSpec
# on a head-addressable layout (no in-kernel 64-lane slicing / concat).
# ---------------------------------------------------------------------------
def _attn_kernel(q_ref, k_ref, v_ref, m_ref, o_ref, *, scale):
    q = q_ref[0, 0, :, :] * scale                   # (S, dh) bf16, scale folded into q
    k = k_ref[0, 0, :, :]
    v = v_ref[0, 0, :, :]
    # NT matmul (contract last dim of both) -> no k.T materialization.
    s = lax.dot_general(q, k, (((1,), (1,)), ((), ())),
                        preferred_element_type=jnp.float32)      # (S, S) f32
    s = s + m_ref[0, :, :]                                        # additive mask bias
    s = s - jnp.max(s, axis=-1, keepdims=True)
    p = jnp.exp(s)
    l = jnp.sum(p, axis=-1, keepdims=True)                        # (S, 1)
    pv = jnp.dot(p.astype(jnp.bfloat16), v, preferred_element_type=jnp.float32)
    # normalize the (S, dh) PV result, not the (S, S) probabilities
    o_ref[0, 0, :, :] = (pv * pl.reciprocal(l, approx=True)).astype(o_ref.dtype)


def pallas_attention(q, k, v, mask_bias, scale):
    # q/k/v: (nH, B, S, dh) bf16.  Output stays head-major (nH, B, S, dh) and is
    # consumed directly by the head-accumulating projection kernel.
    nH, B, S, dh = q.shape
    # TODO(synk): KV-tiled online-softmax (flash) attention for long sequences.
    qkv_spec = pl.BlockSpec((1, 1, S, dh), lambda b, h: (h, b, 0, 0))
    return pl.pallas_call(
        functools.partial(_attn_kernel, scale=scale),
        out_shape=jax.ShapeDtypeStruct((nH, B, S, dh), jnp.bfloat16),
        grid=(B, nH),
        in_specs=[qkv_spec, qkv_spec, qkv_spec,
                  pl.BlockSpec((1, 1, S), lambda b, h: (b, 0, 0))],
        out_specs=pl.BlockSpec((1, 1, S, dh), lambda b, h: (h, b, 0, 0)),
        compiler_params=_cparams("parallel", "parallel"),
    )(q, k, v, mask_bias)


# ---------------------------------------------------------------------------
# Fused: attention output projection (accumulated over heads) + residual + LN
# ---------------------------------------------------------------------------
def _attn_proj_res_ln_kernel(ctx_ref, wo_ref, bo_ref, r_ref, g_ref, beta_ref, o_ref,
                             acc_ref, *, eps):
    h = pl.program_id(1)

    @pl.when(h == 0)
    def _():
        acc_ref[...] = jnp.zeros_like(acc_ref)

    acc_ref[...] += jnp.dot(ctx_ref[0, :, :], wo_ref[0, :, :],
                            preferred_element_type=jnp.float32)

    @pl.when(h == pl.num_programs(1) - 1)
    def _():
        y = acc_ref[...] + bo_ref[...] + r_ref[...].astype(jnp.float32)
        mu = jnp.mean(y, axis=-1, keepdims=True)
        var = jnp.mean((y - mu) ** 2, axis=-1, keepdims=True)
        o_ref[...] = ((y - mu) * lax.rsqrt(var + eps) * g_ref[...]
                      + beta_ref[...]).astype(o_ref.dtype)


def pallas_attn_out_residual_ln(ctx, wo_heads, bo, resid, g, beta, eps=1e-12, tm=None):
    nH, M, dh = ctx.shape
    H = wo_heads.shape[-1]
    tm = _pick_tile(M, tm or DEFAULT_TM, 8)
    return pl.pallas_call(
        functools.partial(_attn_proj_res_ln_kernel, eps=eps),
        out_shape=jax.ShapeDtypeStruct((M, H), jnp.bfloat16),
        grid=(M // tm, nH),
        in_specs=[
            pl.BlockSpec((1, tm, dh), lambda i, h: (h, i, 0)),
            pl.BlockSpec((1, dh, H), lambda i, h: (h, 0, 0)),
            pl.BlockSpec((1, H), lambda i, h: (0, 0)),
            pl.BlockSpec((tm, H), lambda i, h: (i, 0)),
            pl.BlockSpec((1, H), lambda i, h: (0, 0)),
            pl.BlockSpec((1, H), lambda i, h: (0, 0)),
        ],
        out_specs=pl.BlockSpec((tm, H), lambda i, h: (i, 0)),
        scratch_shapes=[pltpu.VMEM((tm, H), jnp.float32)],
        compiler_params=_cparams("parallel", "arbitrary"),
    )(ctx, wo_heads, bo.reshape(1, H), resid, g, beta)


# ---------------------------------------------------------------------------
# Fused FFN: LayerNorm( x + (gelu(x @ w1 + b1) @ w2 + b2) )
# ---------------------------------------------------------------------------
def _ffn_res_ln_kernel(x_ref, w1_ref, b1_ref, w2_ref, b2_ref, g_ref, beta_ref, o_ref, *, eps):
    x = x_ref[...]                                              # (tm, H) bf16 (also residual)
    hdn = jnp.dot(x, w1_ref[...], preferred_element_type=jnp.float32) + b1_ref[...]
    hdn = jax.nn.gelu(hdn, approximate=True)                    # intermediate stays in VMEM
    y = jnp.dot(hdn.astype(jnp.bfloat16), w2_ref[...],
                preferred_element_type=jnp.float32) + b2_ref[...]
    y = y + x.astype(jnp.float32)
    mu = jnp.mean(y, axis=-1, keepdims=True)
    var = jnp.mean((y - mu) ** 2, axis=-1, keepdims=True)
    o_ref[...] = ((y - mu) * lax.rsqrt(var + eps) * g_ref[...] + beta_ref[...]).astype(o_ref.dtype)


def pallas_ffn_residual_ln(x, w1, b1, w2, b2, g, beta, eps=1e-12, tm=None):
    M, H = x.shape
    I = w1.shape[1]
    tm = _pick_tile(M, tm or DEFAULT_TM, 8)
    return pl.pallas_call(
        functools.partial(_ffn_res_ln_kernel, eps=eps),
        out_shape=jax.ShapeDtypeStruct((M, H), jnp.bfloat16),
        grid=(M // tm,),
        in_specs=[
            pl.BlockSpec((tm, H), lambda i: (i, 0)),
            pl.BlockSpec((H, I), lambda i: (0, 0)),
            pl.BlockSpec((1, I), lambda i: (0, 0)),
            pl.BlockSpec((I, H), lambda i: (0, 0)),
            pl.BlockSpec((1, H), lambda i: (0, 0)),
            pl.BlockSpec((1, H), lambda i: (0, 0)),
            pl.BlockSpec((1, H), lambda i: (0, 0)),
        ],
        out_specs=pl.BlockSpec((tm, H), lambda i: (i, 0)),
        compiler_params=_cparams("parallel"),
    )(x, w1, b1.reshape(1, I), w2, b2.reshape(1, H), g, beta)


# ---------------------------------------------------------------------------
# Fused classifier head: fc2(dropout(relu(fc1(x)))); fc_hidden stays in VMEM
# ---------------------------------------------------------------------------
def _head_kernel(x_ref, w1_ref, b1_ref, w2_ref, b2_ref, o_ref, acc_ref):
    k = pl.program_id(1)

    @pl.when(k == 0)
    def _():
        acc_ref[...] = jnp.zeros_like(acc_ref)

    acc_ref[...] += jnp.dot(x_ref[...], w1_ref[...], preferred_element_type=jnp.float32)

    @pl.when(k == pl.num_programs(1) - 1)
    def _():
        hdn = jnp.maximum(acc_ref[...] + b1_ref[...], 0.0)      # ReLU; dropout = identity (eval)
        out = jnp.dot(hdn.astype(jnp.bfloat16), w2_ref[...],
                      preferred_element_type=jnp.float32) + b2_ref[...]
        o_ref[...] = out.astype(o_ref.dtype)


def pallas_classifier_head(x, w1, b1, w2, b2, tm=None, tk=4096):
    M, K = x.shape
    FC = w1.shape[1]
    NC = w2.shape[1]
    npad = ((NC + 127) // 128) * 128          # lane-dense output; real classes sliced after
    w2p = jnp.pad(w2, ((0, 0), (0, npad - NC)))
    b2p = jnp.pad(b2, (0, npad - NC))
    tm = _pick_tile(M, tm or DEFAULT_TM, 8)
    tk = _pick_tile(K, tk, 128)
    out = pl.pallas_call(
        _head_kernel,
        out_shape=jax.ShapeDtypeStruct((M, npad), jnp.float32),
        grid=(M // tm, K // tk),
        in_specs=[
            pl.BlockSpec((tm, tk), lambda i, k: (i, k)),
            pl.BlockSpec((tk, FC), lambda i, k: (k, 0)),
            pl.BlockSpec((1, FC), lambda i, k: (0, 0)),
            pl.BlockSpec((FC, npad), lambda i, k: (0, 0)),
            pl.BlockSpec((1, npad), lambda i, k: (0, 0)),
        ],
        out_specs=pl.BlockSpec((tm, npad), lambda i, k: (i, 0)),
        scratch_shapes=[pltpu.VMEM((tm, FC), jnp.float32)],
        compiler_params=_cparams("parallel", "arbitrary"),
    )(x, w1, b1.reshape(1, FC), w2p, b2p.reshape(1, npad))
    return out[:, :NC]


# ---------------------------------------------------------------------------
# Parameters / model glue (gathers & layout shuffles in XLA, hot paths in Pallas)
# ---------------------------------------------------------------------------
def init_params(key, *, vocab, max_len, hidden, num_layers, inter, fc_hidden,
                num_classes, flat_dim):
    state = [key]

    def nxt():
        state[0], sub = jax.random.split(state[0])
        return sub

    def dense(i, o):
        w = (0.02 * jax.random.normal(nxt(), (i, o), jnp.float32)).astype(jnp.bfloat16)
        return w, jnp.zeros((o,), jnp.float32)

    params = {
        "tok_emb": 0.02 * jax.random.normal(nxt(), (vocab, hidden), jnp.float32),
        "pos_emb": 0.02 * jax.random.normal(nxt(), (max_len, hidden), jnp.float32),
        "type_emb": 0.02 * jax.random.normal(nxt(), (2, hidden), jnp.float32),
        "emb_ln_g": jnp.ones((1, hidden), jnp.float32),
        "emb_ln_b": jnp.zeros((1, hidden), jnp.float32),
        "layers": [],
    }
    for _ in range(num_layers):
        wqkv, bqkv = dense(hidden, 3 * hidden)     # fused Q|K|V projection
        wo, bo = dense(hidden, hidden)
        w1, b1 = dense(hidden, inter)
        w2, b2 = dense(inter, hidden)
        params["layers"].append({
            "wqkv": wqkv, "bqkv": bqkv, "wo": wo, "bo": bo,
            "w1": w1, "b1": b1, "w2": w2, "b2": b2,
            "ln1_g": jnp.ones((1, hidden), jnp.float32), "ln1_b": jnp.zeros((1, hidden), jnp.float32),
            "ln2_g": jnp.ones((1, hidden), jnp.float32), "ln2_b": jnp.zeros((1, hidden), jnp.float32),
        })
    params["fc1_w"], params["fc1_b"] = dense(flat_dim, fc_hidden)
    params["fc2_w"], params["fc2_b"] = dense(fc_hidden, num_classes)
    return params


def transformer_layer(h2, lp, mask_bias, num_heads, B, S):
    H = h2.shape[-1]
    dh = H // num_heads
    scale = 1.0 / math.sqrt(dh)

    qkv = pallas_linear(h2, lp["wqkv"], lp["bqkv"], out_dtype=jnp.bfloat16)   # (B*S, 3H) bf16
    # Head-addressable layout (split by XLA, not by in-kernel 64-lane slicing).
    qkv5 = qkv.reshape(B, S, 3, num_heads, dh).transpose(2, 3, 0, 1, 4)       # (3, nH, B, S, dh)
    ctx = pallas_attention(qkv5[0], qkv5[1], qkv5[2], mask_bias, scale)       # (nH, B, S, dh)
    ctx = ctx.reshape(num_heads, B * S, dh)

    wo_heads = lp["wo"].reshape(num_heads, dh, H)                             # row-grouped by head
    h2 = pallas_attn_out_residual_ln(ctx, wo_heads, lp["bo"], h2,
                                     lp["ln1_g"], lp["ln1_b"])
    h2 = pallas_ffn_residual_ln(h2, lp["w1"], lp["b1"], lp["w2"], lp["b2"],
                                lp["ln2_g"], lp["ln2_b"])
    return h2


def bert_classifier_forward(params, input_ids, attention_mask, num_heads):
    B, S = input_ids.shape
    tok = jnp.take(params["tok_emb"], input_ids, axis=0)            # (B, S, H) gather in XLA
    pos = params["pos_emb"][:S][None, :, :]
    typ = params["type_emb"][0][None, None, :]                      # token_type_ids == 0
    h = tok + pos + typ
    H = h.shape[-1]
    h2 = pallas_layernorm(h.reshape(B * S, H),
                          params["emb_ln_g"], params["emb_ln_b"])   # (B*S, H) bf16

    mask_bias = ((1.0 - attention_mask.astype(jnp.float32)) * -1e9)[:, None, :]   # (B, 1, S)

    for lp in params["layers"]:
        h2 = transformer_layer(h2, lp, mask_bias, num_heads, B, S)

    # last_hidden_state is 3-D -> torch.flatten(x, 1); fc1 -> ReLU -> Dropout -> fc2 -> Dropout
    x = h2.reshape(B, S * H)
    return pallas_classifier_head(x, params["fc1_w"], params["fc1_b"],
                                  params["fc2_w"], params["fc2_b"])


# ---------------------------------------------------------------------------
# Main
# ---------------------------------------------------------------------------
if __name__ == "__main__":
    # Small, consistent scale-down of (seq=512, hidden=768, fc_hidden=512).
    B, S, H = 2, 8, 32
    NUM_HEADS, LAYERS, INTER = 4, 2, 64
    VOCAB, FC_HIDDEN, NUM_CLASSES = 100, 64, 4

    key = jax.random.PRNGKey(0)
    pkey, ikey = jax.random.split(key)

    params = init_params(pkey, vocab=VOCAB, max_len=S, hidden=H, num_layers=LAYERS,
                         inter=INTER, fc_hidden=FC_HIDDEN, num_classes=NUM_CLASSES,
                         flat_dim=S * H)

    input_ids = jax.random.randint(ikey, (B, S), 0, VOCAB, dtype=jnp.int32)
    attention_mask = jnp.ones((B, S), jnp.int32)

    forward = jax.jit(functools.partial(bert_classifier_forward, num_heads=NUM_HEADS))
    logits = forward(params, input_ids, attention_mask)
    logits = jax.block_until_ready(logits)
    assert logits.shape == (B, NUM_CLASSES), logits.shape
    assert bool(jnp.all(jnp.isfinite(logits)))
    print("KERNEL_OK")
</pallas_src>

<mosaic_0001>
module attributes {stable_mosaic.version = 11 : i64} {
  func.func @_ln_kernel(%arg0: i32, %arg1: memref<16x32xf32, #tpu.memory_space<vmem>>, %arg2: memref<1x32xf32, #tpu.memory_space<vmem>>, %arg3: memref<1x32xf32, #tpu.memory_space<vmem>>, %arg4: memref<16x32xbf16, #tpu.memory_space<vmem>>) attributes {dimension_semantics = [#tpu.dimension_semantics<parallel>], iteration_bounds = array<i64: 1>, scalar_prefetch = 0 : i64, scratch_operands = 0 : i64, tpu.core_type = #tpu.core_type<tc>, window_params = [{transform_indices = @transform_0, window_bounds = array<i64: 16, 32>}, {pipeline_mode = #tpu.pipeline_mode<synchronous>, transform_indices = @transform_1, window_bounds = array<i64: 1, 32>}, {pipeline_mode = #tpu.pipeline_mode<synchronous>, transform_indices = @transform_2, window_bounds = array<i64: 1, 32>}, {transform_indices = @transform_3, window_bounds = array<i64: 16, 32>}]} {
    %c0 = arith.constant 0 : index
    %c0_0 = arith.constant 0 : index
    %0 = vector.load %arg1[%c0, %c0_0] : memref<16x32xf32, #tpu.memory_space<vmem>>, vector<16x32xf32>
    %cst = arith.constant dense<0.000000e+00> : vector<16xf32>
    %1 = vector.multi_reduction <add>, %0, %cst [1] : vector<16x32xf32> to vector<16xf32>
    %2 = vector.shape_cast %1 : vector<16xf32> to vector<16x1xf32>
    %cst_1 = arith.constant 3.200000e+01 : f32
    %3 = vector.broadcast %cst_1 : f32 to vector<16x1xf32>
    %4 = arith.divf %2, %3 : vector<16x1xf32>
    %5 = vector.broadcast %4 : vector<16x1xf32> to vector<16x32xf32>
    %6 = arith.subf %0, %5 : vector<16x32xf32>
    %7 = arith.mulf %6, %6 : vector<16x32xf32>
    %cst_2 = arith.constant dense<0.000000e+00> : vector<16xf32>
    %8 = vector.multi_reduction <add>, %7, %cst_2 [1] : vector<16x32xf32> to vector<16xf32>
    %9 = vector.shape_cast %8 : vector<16xf32> to vector<16x1xf32>
    %cst_3 = arith.constant 3.200000e+01 : f32
    %10 = vector.broadcast %cst_3 : f32 to vector<16x1xf32>
    %11 = arith.divf %9, %10 : vector<16x1xf32>
    %12 = vector.broadcast %4 : vector<16x1xf32> to vector<16x32xf32>
    %13 = arith.subf %0, %12 : vector<16x32xf32>
    %cst_4 = arith.constant 9.99999996E-13 : f32
    %14 = vector.broadcast %cst_4 : f32 to vector<16x1xf32>
    %15 = arith.addf %11, %14 : vector<16x1xf32>
    %16 = math.rsqrt %15 : vector<16x1xf32>
    %17 = vector.broadcast %16 : vector<16x1xf32> to vector<16x32xf32>
    %18 = arith.mulf %13, %17 : vector<16x32xf32>
    %c0_5 = arith.constant 0 : index
    %c0_6 = arith.constant 0 : index
    %19 = vector.load %arg2[%c0_5, %c0_6] : memref<1x32xf32, #tpu.memory_space<vmem>>, vector<1x32xf32>
    %20 = vector.broadcast %19 : vector<1x32xf32> to vector<16x32xf32>
    %21 = arith.mulf %18, %20 : vector<16x32xf32>
    %c0_7 = arith.constant 0 : index
    %c0_8 = arith.constant 0 : index
    %22 = vector.load %arg3[%c0_7, %c0_8] : memref<1x32xf32, #tpu.memory_space<vmem>>, vector<1x32xf32>
    %23 = vector.broadcast %22 : vector<1x32xf32> to vector<16x32xf32>
    %24 = arith.addf %21, %23 : vector<16x32xf32>
    %25 = arith.truncf %24 : vector<16x32xf32> to vector<16x32xbf16>
    %c0_9 = arith.constant 0 : index
    %c0_10 = arith.constant 0 : index
    %26 = vector.load %arg4[%c0_9, %c0_10] : memref<16x32xbf16, #tpu.memory_space<vmem>>, vector<16x32xbf16>
    tpu.vector_store %arg4[%c0_9, %c0_10], %25 {strides = array<i32>} : memref<16x32xbf16, #tpu.memory_space<vmem>>, vector<16x32xbf16>,
    return
  }
  func.func @transform_0(%arg0: i32) -> (i32, i32) {
    %c0_i32 = arith.constant 0 : i32
    %c0_i32_0 = arith.constant 0 : i32
    return %arg0, %c0_i32 : i32, i32
  }
  func.func @transform_1(%arg0: i32) -> (i32, i32) {
    %c0_i32 = arith.constant 0 : i32
    %c0_i32_0 = arith.constant 0 : i32
    %c0_i32_1 = arith.constant 0 : i32
    return %c0_i32, %c0_i32_0 : i32, i32
  }
  func.func @transform_2(%arg0: i32) -> (i32, i32) {
    %c0_i32 = arith.constant 0 : i32
    %c0_i32_0 = arith.constant 0 : i32
    %c0_i32_1 = arith.constant 0 : i32
    return %c0_i32, %c0_i32_0 : i32, i32
  }
  func.func @transform_3(%arg0: i32) -> (i32, i32) {
    %c0_i32 = arith.constant 0 : i32
    %c0_i32_0 = arith.constant 0 : i32
    return %arg0, %c0_i32 : i32, i32
  }
}

module attributes {stable_mosaic.version = 11 : i64} {
  func.func @_linear_kernel(%arg0: i32, %arg1: i32, %arg2: memref<16x32xbf16, #tpu.memory_space<vmem>>, %arg3: memref<32x96xbf16, #tpu.memory_space<vmem>>, %arg4: memref<1x96xf32, #tpu.memory_space<vmem>>, %arg5: memref<16x96xbf16, #tpu.memory_space<vmem>>) attributes {dimension_semantics = [#tpu.dimension_semantics<parallel>, #tpu.dimension_semantics<parallel>], iteration_bounds = array<i64: 1, 1>, scalar_prefetch = 0 : i64, scratch_operands = 0 : i64, tpu.core_type = #tpu.core_type<tc>, window_params = [{transform_indices = @transform_0, window_bounds = array<i64: 16, 32>}, {transform_indices = @transform_1, window_bounds = array<i64: 32, 96>}, {transform_indices = @transform_2, window_bounds = array<i64: 1, 96>}, {transform_indices = @transform_3, window_bounds = array<i64: 16, 96>}]} {
    %c0 = arith.constant 0 : index
    %c0_0 = arith.constant 0 : index
    %0 = vector.load %arg2[%c0, %c0_0] : memref<16x32xbf16, #tpu.memory_space<vmem>>, vector<16x32xbf16>
    %c0_1 = arith.constant 0 : index
    %c0_2 = arith.constant 0 : index
    %1 = vector.load %arg3[%c0_1, %c0_2] : memref<32x96xbf16, #tpu.memory_space<vmem>>, vector<32x96xbf16>
    %cst = arith.constant dense<0.000000e+00> : vector<16x96xf32>
    %2 = tpu.matmul %0, %1, %cst {dimension_numbers = #tpu.dot_dimension_numbers<[1], [0], [0], [1], [0, 0, 1, 1], [], []>} : vector<16x32xbf16>, vector<32x96xbf16>, vector<16x96xf32> -> vector<16x96xf32>
    %c0_3 = arith.constant 0 : index
    %c0_4 = arith.constant 0 : index
    %3 = vector.load %arg4[%c0_3, %c0_4] : memref<1x96xf32, #tpu.memory_space<vmem>>, vector<1x96xf32>
    %4 = vector.broadcast %3 : vector<1x96xf32> to vector<16x96xf32>
    %5 = arith.addf %2, %4 : vector<16x96xf32>
    %6 = arith.truncf %5 : vector<16x96xf32> to vector<16x96xbf16>
    %c0_5 = arith.constant 0 : index
    %c0_6 = arith.constant 0 : index
    %7 = vector.load %arg5[%c0_5, %c0_6] : memref<16x96xbf16, #tpu.memory_space<vmem>>, vector<16x96xbf16>
    tpu.vector_store %arg5[%c0_5, %c0_6], %6 {strides = array<i32>} : memref<16x96xbf16, #tpu.memory_space<vmem>>, vector<16x96xbf16>,
    return
  }
  func.func @transform_0(%arg0: i32, %arg1: i32) -> (i32, i32) {
    %c0_i32 = arith.constant 0 : i32
    %c0_i32_0 = arith.constant 0 : i32
    return %arg0, %c0_i32 : i32, i32
  }
  func.func @transform_1(%arg0: i32, %arg1: i32) -> (i32, i32) {
    %c0_i32 = arith.constant 0 : i32
    %c0_i32_0 = arith.constant 0 : i32
    return %c0_i32, %arg1 : i32, i32
  }
  func.func @transform_2(%arg0: i32, %arg1: i32) -> (i32, i32) {
    %c0_i32 = arith.constant 0 : i32
    %c0_i32_0 = arith.constant 0 : i32
    return %c0_i32, %arg1 : i32, i32
  }
  func.func @transform_3(%arg0: i32, %arg1: i32) -> (i32, i32) {
    %c0_i32 = arith.constant 0 : i32
    return %arg0, %arg1 : i32, i32
  }
}

module attributes {stable_mosaic.version = 11 : i64} {
  func.func @_attn_kernel(%arg0: i32, %arg1: i32, %arg2: memref<1x1x8x8xbf16, #tpu.memory_space<vmem>>, %arg3: memref<1x1x8x8xbf16, #tpu.memory_space<vmem>>, %arg4: memref<1x1x8x8xbf16, #tpu.memory_space<vmem>>, %arg5: memref<1x1x8xf32, #tpu.memory_space<vmem>>, %arg6: memref<1x1x8x8xbf16, #tpu.memory_space<vmem>>) attributes {dimension_semantics = [#tpu.dimension_semantics<parallel>, #tpu.dimension_semantics<parallel>], iteration_bounds = array<i64: 2, 4>, scalar_prefetch = 0 : i64, scratch_operands = 0 : i64, tpu.core_type = #tpu.core_type<tc>, window_params = [{transform_indices = @transform_0, window_bounds = array<i64: 1, 1, 8, 8>}, {transform_indices = @transform_1, window_bounds = array<i64: 1, 1, 8, 8>}, {transform_indices = @transform_2, window_bounds = array<i64: 1, 1, 8, 8>}, {transform_indices = @transform_3, window_bounds = array<i64: 1, 1, 8>}, {transform_indices = @transform_4, window_bounds = array<i64: 1, 1, 8, 8>}]} {
    %c0 = arith.constant 0 : index
    %c0_0 = arith.constant 0 : index
    %c0_1 = arith.constant 0 : index
    %c0_2 = arith.constant 0 : index
    %0 = vector.load %arg2[%c0, %c0_0, %c0_1, %c0_2] : memref<1x1x8x8xbf16, #tpu.memory_space<vmem>>, vector<1x1x8x8xbf16>
    %1 = vector.shape_cast %0 : vector<1x1x8x8xbf16> to vector<8x8xbf16>
    %cst = arith.constant 3.535160e-01 : bf16
    %2 = vector.broadcast %cst : bf16 to vector<8x8xbf16>
    %3 = arith.mulf %1, %2 : vector<8x8xbf16>
    %c0_3 = arith.constant 0 : index
    %c0_4 = arith.constant 0 : index
    %c0_5 = arith.constant 0 : index
    %c0_6 = arith.constant 0 : index
    %4 = vector.load %arg3[%c0_3, %c0_4, %c0_5, %c0_6] : memref<1x1x8x8xbf16, #tpu.memory_space<vmem>>, vector<1x1x8x8xbf16>
    %5 = vector.shape_cast %4 : vector<1x1x8x8xbf16> to vector<8x8xbf16>
    %c0_7 = arith.constant 0 : index
    %c0_8 = arith.constant 0 : index
    %c0_9 = arith.constant 0 : index
    %c0_10 = arith.constant 0 : index
    %6 = vector.load %arg4[%c0_7, %c0_8, %c0_9, %c0_10] : memref<1x1x8x8xbf16, #tpu.memory_space<vmem>>, vector<1x1x8x8xbf16>
    %7 = vector.shape_cast %6 : vector<1x1x8x8xbf16> to vector<8x8xbf16>
    %cst_11 = arith.constant dense<0.000000e+00> : vector<8x8xf32>
    %8 = tpu.matmul %3, %5, %cst_11 {dimension_numbers = #tpu.dot_dimension_numbers<[1], [1], [0], [0], [0, 0, 1, 0], [], []>} : vector<8x8xbf16>, vector<8x8xbf16>, vector<8x8xf32> -> vector<8x8xf32>
    %c0_12 = arith.constant 0 : index
    %c0_13 = arith.constant 0 : index
    %c0_14 = arith.constant 0 : index
    %9 = vector.load %arg5[%c0_12, %c0_13, %c0_14] : memref<1x1x8xf32, #tpu.memory_space<vmem>>, vector<1x1x8xf32>
    %10 = vector.shape_cast %9 : vector<1x1x8xf32> to vector<1x8xf32>
    %11 = vector.broadcast %10 : vector<1x8xf32> to vector<8x8xf32>
    %12 = arith.addf %8, %11 : vector<8x8xf32>
    %cst_15 = arith.constant dense<0xFF800000> : vector<8xf32>
    %13 = vector.multi_reduction <maximumf>, %12, %cst_15 [1] : vector<8x8xf32> to vector<8xf32>
    %14 = vector.shape_cast %13 : vector<8xf32> to vector<8x1xf32>
    %15 = vector.broadcast %14 : vector<8x1xf32> to vector<8x8xf32>
    %16 = arith.subf %12, %15 : vector<8x8xf32>
    %17 = math.exp %16 : vector<8x8xf32>
    %cst_16 = arith.constant dense<0.000000e+00> : vector<8xf32>
    %18 = vector.multi_reduction <add>, %17, %cst_16 [1] : vector<8x8xf32> to vector<8xf32>
    %19 = vector.shape_cast %18 : vector<8xf32> to vector<8x1xf32>
    %20 = arith.truncf %17 : vector<8x8xf32> to vector<8x8xbf16>
    %cst_17 = arith.constant dense<0.000000e+00> : vector<8x8xf32>
    %21 = tpu.matmul %20, %7, %cst_17 {dimension_numbers = #tpu.dot_dimension_numbers<[1], [0], [0], [1], [0, 0, 1, 1], [], []>} : vector<8x8xbf16>, vector<8x8xbf16>, vector<8x8xf32> -> vector<8x8xf32>
    %22 = tpu.reciprocal %19 {approx = true} : vector<8x1xf32> -> vector<8x1xf32>
    %23 = vector.broadcast %22 : vector<8x1xf32> to vector<8x8xf32>
    %24 = arith.mulf %21, %23 : vector<8x8xf32>
    %25 = arith.truncf %24 : vector<8x8xf32> to vector<8x8xbf16>
    %c0_18 = arith.constant 0 : index
    %c0_19 = arith.constant 0 : index
    %c0_20 = arith.constant 0 : index
    %c0_21 = arith.constant 0 : index
    %26 = vector.load %arg6[%c0_18, %c0_19, %c0_20, %c0_21] : memref<1x1x8x8xbf16, #tpu.memory_space<vmem>>, vector<1x1x8x8xbf16>
    %27 = vector.shape_cast %26 : vector<1x1x8x8xbf16> to vector<8x8xbf16>
    %28 = vector.shape_cast %25 : vector<8x8xbf16> to vector<1x1x8x8xbf16>
    tpu.vector_store %arg6[%c0_18, %c0_19, %c0_20, %c0_21], %28 {strides = array<i32>} : memref<1x1x8x8xbf16, #tpu.memory_space<vmem>>, vector<1x1x8x8xbf16>,
    return
  }
  func.func @transform_0(%arg0: i32, %arg1: i32) -> (i32, i32, i32, i32) {
    %c0_i32 = arith.constant 0 : i32
    %c0_i32_0 = arith.constant 0 : i32
    %c0_i32_1 = arith.constant 0 : i32
    return %arg1, %arg0, %c0_i32, %c0_i32_0 : i32, i32, i32, i32
  }
  func.func @transform_1(%arg0: i32, %arg1: i32) -> (i32, i32, i32, i32) {
    %c0_i32 = arith.constant 0 : i32
    %c0_i32_0 = arith.constant 0 : i32
    %c0_i32_1 = arith.constant 0 : i32
    return %arg1, %arg0, %c0_i32, %c0_i32_0 : i32, i32, i32, i32
  }
  func.func @transform_2(%arg0: i32, %arg1: i32) -> (i32, i32, i32, i32) {
    %c0_i32 = arith.constant 0 : i32
    %c0_i32_0 = arith.constant 0 : i32
    %c0_i32_1 = arith.constant 0 : i32
    return %arg1, %arg0, %c0_i32, %c0_i32_0 : i32, i32, i32, i32
  }
  func.func @transform_3(%arg0: i32, %arg1: i32) -> (i32, i32, i32) {
    %c0_i32 = arith.constant 0 : i32
    %c0_i32_0 = arith.constant 0 : i32
    %c0_i32_1 = arith.constant 0 : i32
    return %arg0, %c0_i32, %c0_i32_0 : i32, i32, i32
  }
  func.func @transform_4(%arg0: i32, %arg1: i32) -> (i32, i32, i32, i32) {
    %c0_i32 = arith.constant 0 : i32
    %c0_i32_0 = arith.constant 0 : i32
    %c0_i32_1 = arith.constant 0 : i32
    return %arg1, %arg0, %c0_i32, %c0_i32_0 : i32, i32, i32, i32
  }
}

module attributes {stable_mosaic.version = 11 : i64} {
  func.func @_attn_proj_res_ln_kernel(%arg0: i32, %arg1: i32, %arg2: memref<1x16x8xbf16, #tpu.memory_space<vmem>>, %arg3: memref<1x8x32xbf16, #tpu.memory_space<vmem>>, %arg4: memref<1x32xf32, #tpu.memory_space<vmem>>, %arg5: memref<16x32xbf16, #tpu.memory_space<vmem>>, %arg6: memref<1x32xf32, #tpu.memory_space<vmem>>, %arg7: memref<1x32xf32, #tpu.memory_space<vmem>>, %arg8: memref<16x32xbf16, #tpu.memory_space<vmem>>, %arg9: memref<16x32xf32, #tpu.memory_space<vmem>>) attributes {dimension_semantics = [#tpu.dimension_semantics<parallel>, #tpu.dimension_semantics<arbitrary>], iteration_bounds = array<i64: 1, 4>, scalar_prefetch = 0 : i64, scratch_operands = 1 : i64, tpu.core_type = #tpu.core_type<tc>, window_params = [{transform_indices = @transform_0, window_bounds = array<i64: 1, 16, 8>}, {transform_indices = @transform_1, window_bounds = array<i64: 1, 8, 32>}, {pipeline_mode = #tpu.pipeline_mode<synchronous>, transform_indices = @transform_2, window_bounds = array<i64: 1, 32>}, {transform_indices = @transform_3, window_bounds = array<i64: 16, 32>}, {pipeline_mode = #tpu.pipeline_mode<synchronous>, transform_indices = @transform_4, window_bounds = array<i64: 1, 32>}, {pipeline_mode = #tpu.pipeline_mode<synchronous>, transform_indices = @transform_5, window_bounds = array<i64: 1, 32>}, {transform_indices = @transform_6, window_bounds = array<i64: 16, 32>}]} {
    %c0_i32 = arith.constant 0 : i32
    %0 = arith.cmpi eq, %arg1, %c0_i32 : i32
    %1 = arith.extui %0 : i1 to i32
    %c0_i32_0 = arith.constant 0 : i32
    %2 = arith.cmpi ne, %1, %c0_i32_0 : i32
    scf.if %2 {
      %cst_11 = arith.constant 0.000000e+00 : f32
      %14 = vector.broadcast %cst_11 : f32 to vector<16x32xf32>
      %c0_12 = arith.constant 0 : index
      %c0_13 = arith.constant 0 : index
      %15 = vector.load %arg9[%c0_12, %c0_13] : memref<16x32xf32, #tpu.memory_space<vmem>>, vector<16x32xf32>
      tpu.vector_store %arg9[%c0_12, %c0_13], %14 {strides = array<i32>} : memref<16x32xf32, #tpu.memory_space<vmem>>, vector<16x32xf32>,
    } else {
    }
    %c0 = arith.constant 0 : index
    %c0_1 = arith.constant 0 : index
    %3 = vector.load %arg9[%c0, %c0_1] : memref<16x32xf32, #tpu.memory_space<vmem>>, vector<16x32xf32>
    %c0_2 = arith.constant 0 : index
    %c0_3 = arith.constant 0 : index
    %c0_4 = arith.constant 0 : index
    %4 = vector.load %arg2[%c0_2, %c0_3, %c0_4] : memref<1x16x8xbf16, #tpu.memory_space<vmem>>, vector<1x16x8xbf16>
    %5 = vector.shape_cast %4 : vector<1x16x8xbf16> to vector<16x8xbf16>
    %c0_5 = arith.constant 0 : index
    %c0_6 = arith.constant 0 : index
    %c0_7 = arith.constant 0 : index
    %6 = vector.load %arg3[%c0_5, %c0_6, %c0_7] : memref<1x8x32xbf16, #tpu.memory_space<vmem>>, vector<1x8x32xbf16>
    %7 = vector.shape_cast %6 : vector<1x8x32xbf16> to vector<8x32xbf16>
    %cst = arith.constant dense<0.000000e+00> : vector<16x32xf32>
    %8 = tpu.matmul %5, %7, %cst {dimension_numbers = #tpu.dot_dimension_numbers<[1], [0], [0], [1], [0, 0, 1, 1], [], []>} : vector<16x8xbf16>, vector<8x32xbf16>, vector<16x32xf32> -> vector<16x32xf32>
    %9 = arith.addf %3, %8 : vector<16x32xf32>
    %c0_8 = arith.constant 0 : index
    %c0_9 = arith.constant 0 : index
    %10 = vector.load %arg9[%c0_8, %c0_9] : memref<16x32xf32, #tpu.memory_space<vmem>>, vector<16x32xf32>
    tpu.vector_store %arg9[%c0_8, %c0_9], %9 {strides = array<i32>} : memref<16x32xf32, #tpu.memory_space<vmem>>, vector<16x32xf32>,
    %c3_i32 = arith.constant 3 : i32
    %11 = arith.cmpi eq, %arg1, %c3_i32 : i32
    %12 = arith.extui %11 : i1 to i32
    %c0_i32_10 = arith.constant 0 : i32
    %13 = arith.cmpi ne, %12, %c0_i32_10 : i32
    scf.if %13 {
      %c0_11 = arith.constant 0 : index
      %c0_12 = arith.constant 0 : index
      %14 = vector.load %arg9[%c0_11, %c0_12] : memref<16x32xf32, #tpu.memory_space<vmem>>, vector<16x32xf32>
      %c0_13 = arith.constant 0 : index
      %c0_14 = arith.constant 0 : index
      %15 = vector.load %arg4[%c0_13, %c0_14] : memref<1x32xf32, #tpu.memory_space<vmem>>, vector<1x32xf32>
      %16 = vector.broadcast %15 : vector<1x32xf32> to vector<16x32xf32>
      %17 = arith.addf %14, %16 : vector<16x32xf32>
      %c0_15 = arith.constant 0 : index
      %c0_16 = arith.constant 0 : index
      %18 = vector.load %arg5[%c0_15, %c0_16] : memref<16x32xbf16, #tpu.memory_space<vmem>>, vector<16x32xbf16>
      %19 = arith.extf %18 : vector<16x32xbf16> to vector<16x32xf32>
      %20 = arith.addf %17, %19 : vector<16x32xf32>
      %cst_17 = arith.constant dense<0.000000e+00> : vector<16xf32>
      %21 = vector.multi_reduction <add>, %20, %cst_17 [1] : vector<16x32xf32> to vector<16xf32>
      %22 = vector.shape_cast %21 : vector<16xf32> to vector<16x1xf32>
      %cst_18 = arith.constant 3.200000e+01 : f32
      %23 = vector.broadcast %cst_18 : f32 to vector<16x1xf32>
      %24 = arith.divf %22, %23 : vector<16x1xf32>
      %25 = vector.broadcast %24 : vector<16x1xf32> to vector<16x32xf32>
      %26 = arith.subf %20, %25 : vector<16x32xf32>
      %27 = arith.mulf %26, %26 : vector<16x32xf32>
      %cst_19 = arith.constant dense<0.000000e+00> : vector<16xf32>
      %28 = vector.multi_reduction <add>, %27, %cst_19 [1] : vector<16x32xf32> to vector<16xf32>
      %29 = vector.shape_cast %28 : vector<16xf32> to vector<16x1xf32>
      %cst_20 = arith.constant 3.200000e+01 : f32
      %30 = vector.broadcast %cst_20 : f32 to vector<16x1xf32>
      %31 = arith.divf %29, %30 : vector<16x1xf32>
      %32 = vector.broadcast %24 : vector<16x1xf32> to vector<16x32xf32>
      %33 = arith.subf %20, %32 : vector<16x32xf32>
      %cst_21 = arith.constant 9.99999996E-13 : f32
      %34 = vector.broadcast %cst_21 : f32 to vector<16x1xf32>
      %35 = arith.addf %31, %34 : vector<16x1xf32>
      %36 = math.rsqrt %35 : vector<16x1xf32>
      %37 = vector.broadcast %36 : vector<16x1xf32> to vector<16x32xf32>
      %38 = arith.mulf %33, %37 : vector<16x32xf32>
      %c0_22 = arith.constant 0 : index
      %c0_23 = arith.constant 0 : index
      %39 = vector.load %arg6[%c0_22, %c0_23] : memref<1x32xf32, #tpu.memory_space<vmem>>, vector<1x32xf32>
      %40 = vector.broadcast %39 : vector<1x32xf32> to vector<16x32xf32>
      %41 = arith.mulf %38, %40 : vector<16x32xf32>
      %c0_24 = arith.constant 0 : index
      %c0_25 = arith.constant 0 : index
      %42 = vector.load %arg7[%c0_24, %c0_25] : memref<1x32xf32, #tpu.memory_space<vmem>>, vector<1x32xf32>
      %43 = vector.broadcast %42 : vector<1x32xf32> to vector<16x32xf32>
      %44 = arith.addf %41, %43 : vector<16x32xf32>
      %45 = arith.truncf %44 : vector<16x32xf32> to vector<16x32xbf16>
      %c0_26 = arith.constant 0 : index
      %c0_27 = arith.constant 0 : index
      %46 = vector.load %arg8[%c0_26, %c0_27] : memref<16x32xbf16, #tpu.memory_space<vmem>>, vector<16x32xbf16>
      tpu.vector_store %arg8[%c0_26, %c0_27], %45 {strides = array<i32>} : memref<16x32xbf16, #tpu.memory_space<vmem>>, vector<16x32xbf16>,
    } else {
    }
    return
  }
  func.func @transform_0(%arg0: i32, %arg1: i32) -> (i32, i32, i32) {
    %c0_i32 = arith.constant 0 : i32
    %c0_i32_0 = arith.constant 0 : i32
    return %arg1, %arg0, %c0_i32 : i32, i32, i32
  }
  func.func @transform_1(%arg0: i32, %arg1: i32) -> (i32, i32, i32) {
    %c0_i32 = arith.constant 0 : i32
    %c0_i32_0 = arith.constant 0 : i32
    %c0_i32_1 = arith.constant 0 : i32
    return %arg1, %c0_i32, %c0_i32_0 : i32, i32, i32
  }
  func.func @transform_2(%arg0: i32, %arg1: i32) -> (i32, i32) {
    %c0_i32 = arith.constant 0 : i32
    %c0_i32_0 = arith.constant 0 : i32
    %c0_i32_1 = arith.constant 0 : i32
    return %c0_i32, %c0_i32_0 : i32, i32
  }
  func.func @transform_3(%arg0: i32, %arg1: i32) -> (i32, i32) {
    %c0_i32 = arith.constant 0 : i32
    %c0_i32_0 = arith.constant 0 : i32
    return %arg0, %c0_i32 : i32, i32
  }
  func.func @transform_4(%arg0: i32, %arg1: i32) -> (i32, i32) {
    %c0_i32 = arith.constant 0 : i32
    %c0_i32_0 = arith.constant 0 : i32
    %c0_i32_1 = arith.constant 0 : i32
    return %c0_i32, %c0_i32_0 : i32, i32
  }
  func.func @transform_5(%arg0: i32, %arg1: i32) -> (i32, i32) {
    %c0_i32 = arith.constant 0 : i32
    %c0_i32_0 = arith.constant 0 : i32
    %c0_i32_1 = arith.constant 0 : i32
    return %c0_i32, %c0_i32_0 : i32, i32
  }
  func.func @transform_6(%arg0: i32, %arg1: i32) -> (i32, i32) {
    %c0_i32 = arith.constant 0 : i32
    %c0_i32_0 = arith.constant 0 : i32
    return %arg0, %c0_i32 : i32, i32
  }
}

module attributes {stable_mosaic.version = 11 : i64} {
  func.func @_ffn_res_ln_kernel(%arg0: i32, %arg1: memref<16x32xbf16, #tpu.memory_space<vmem>>, %arg2: memref<32x64xbf16, #tpu.memory_space<vmem>>, %arg3: memref<1x64xf32, #tpu.memory_space<vmem>>, %arg4: memref<64x32xbf16, #tpu.memory_space<vmem>>, %arg5: memref<1x32xf32, #tpu.memory_space<vmem>>, %arg6: memref<1x32xf32, #tpu.memory_space<vmem>>, %arg7: memref<1x32xf32, #tpu.memory_space<vmem>>, %arg8: memref<16x32xbf16, #tpu.memory_space<vmem>>) attributes {dimension_semantics = [#tpu.dimension_semantics<parallel>], iteration_bounds = array<i64: 1>, scalar_prefetch = 0 : i64, scratch_operands = 0 : i64, tpu.core_type = #tpu.core_type<tc>, window_params = [{transform_indices = @transform_0, window_bounds = array<i64: 16, 32>}, {pipeline_mode = #tpu.pipeline_mode<synchronous>, transform_indices = @transform_1, window_bounds = array<i64: 32, 64>}, {pipeline_mode = #tpu.pipeline_mode<synchronous>, transform_indices = @transform_2, window_bounds = array<i64: 1, 64>}, {pipeline_mode = #tpu.pipeline_mode<synchronous>, transform_indices = @transform_3, window_bounds = array<i64: 64, 32>}, {pipeline_mode = #tpu.pipeline_mode<synchronous>, transform_indices = @transform_4, window_bounds = array<i64: 1, 32>}, {pipeline_mode = #tpu.pipeline_mode<synchronous>, transform_indices = @transform_5, window_bounds = array<i64: 1, 32>}, {pipeline_mode = #tpu.pipeline_mode<synchronous>, transform_indices = @transform_6, window_bounds = array<i64: 1, 32>}, {transform_indices = @transform_7, window_bounds = array<i64: 16, 32>}]} {
    %c0 = arith.constant 0 : index
    %c0_0 = arith.constant 0 : index
    %0 = vector.load %arg1[%c0, %c0_0] : memref<16x32xbf16, #tpu.memory_space<vmem>>, vector<16x32xbf16>
    %c0_1 = arith.constant 0 : index
    %c0_2 = arith.constant 0 : index
    %1 = vector.load %arg2[%c0_1, %c0_2] : memref<32x64xbf16, #tpu.memory_space<vmem>>, vector<32x64xbf16>
    %cst = arith.constant dense<0.000000e+00> : vector<16x64xf32>
    %2 = tpu.matmul %0, %1, %cst {dimension_numbers = #tpu.dot_dimension_numbers<[1], [0], [0], [1], [0, 0, 1, 1], [], []>} : vector<16x32xbf16>, vector<32x64xbf16>, vector<16x64xf32> -> vector<16x64xf32>
    %c0_3 = arith.constant 0 : index
    %c0_4 = arith.constant 0 : index
    %3 = vector.load %arg3[%c0_3, %c0_4] : memref<1x64xf32, #tpu.memory_space<vmem>>, vector<1x64xf32>
    %4 = vector.broadcast %3 : vector<1x64xf32> to vector<16x64xf32>
    %5 = arith.addf %2, %4 : vector<16x64xf32>
    %6 = arith.mulf %5, %5 : vector<16x64xf32>
    %7 = arith.mulf %5, %6 : vector<16x64xf32>
    %cst_5 = arith.constant 4.471500e-02 : f32
    %8 = vector.broadcast %cst_5 : f32 to vector<16x64xf32>
    %9 = arith.mulf %8, %7 : vector<16x64xf32>
    %10 = arith.addf %5, %9 : vector<16x64xf32>
    %cst_6 = arith.constant 0.797884583 : f32
    %11 = vector.broadcast %cst_6 : f32 to vector<16x64xf32>
    %12 = arith.mulf %11, %10 : vector<16x64xf32>
    %13 = math.tanh %12 : vector<16x64xf32>
    %cst_7 = arith.constant 1.000000e+00 : f32
    %14 = vector.broadcast %cst_7 : f32 to vector<16x64xf32>
    %15 = arith.addf %14, %13 : vector<16x64xf32>
    %cst_8 = arith.constant 5.000000e-01 : f32
    %16 = vector.broadcast %cst_8 : f32 to vector<16x64xf32>
    %17 = arith.mulf %16, %15 : vector<16x64xf32>
    %18 = arith.mulf %5, %17 : vector<16x64xf32>
    %19 = arith.truncf %18 : vector<16x64xf32> to vector<16x64xbf16>
    %c0_9 = arith.constant 0 : index
    %c0_10 = arith.constant 0 : index
    %20 = vector.load %arg4[%c0_9, %c0_10] : memref<64x32xbf16, #tpu.memory_space<vmem>>, vector<64x32xbf16>
    %cst_11 = arith.constant dense<0.000000e+00> : vector<16x32xf32>
    %21 = tpu.matmul %19, %20, %cst_11 {dimension_numbers = #tpu.dot_dimension_numbers<[1], [0], [0], [1], [0, 0, 1, 1], [], []>} : vector<16x64xbf16>, vector<64x32xbf16>, vector<16x32xf32> -> vector<16x32xf32>
    %c0_12 = arith.constant 0 : index
    %c0_13 = arith.constant 0 : index
    %22 = vector.load %arg5[%c0_12, %c0_13] : memref<1x32xf32, #tpu.memory_space<vmem>>, vector<1x32xf32>
    %23 = vector.broadcast %22 : vector<1x32xf32> to vector<16x32xf32>
    %24 = arith.addf %21, %23 : vector<16x32xf32>
    %25 = arith.extf %0 : vector<16x32xbf16> to vector<16x32xf32>
    %26 = arith.addf %24, %25 : vector<16x32xf32>
    %cst_14 = arith.constant dense<0.000000e+00> : vector<16xf32>
    %27 = vector.multi_reduction <add>, %26, %cst_14 [1] : vector<16x32xf32> to vector<16xf32>
    %28 = vector.shape_cast %27 : vector<16xf32> to vector<16x1xf32>
    %cst_15 = arith.constant 3.200000e+01 : f32
    %29 = vector.broadcast %cst_15 : f32 to vector<16x1xf32>
    %30 = arith.divf %28, %29 : vector<16x1xf32>
    %31 = vector.broadcast %30 : vector<16x1xf32> to vector<16x32xf32>
    %32 = arith.subf %26, %31 : vector<16x32xf32>
    %33 = arith.mulf %32, %32 : vector<16x32xf32>
    %cst_16 = arith.constant dense<0.000000e+00> : vector<16xf32>
    %34 = vector.multi_reduction <add>, %33, %cst_16 [1] : vector<16x32xf32> to vector<16xf32>
    %35 = vector.shape_cast %34 : vector<16xf32> to vector<16x1xf32>
    %cst_17 = arith.constant 3.200000e+01 : f32
    %36 = vector.broadcast %cst_17 : f32 to vector<16x1xf32>
    %37 = arith.divf %35, %36 : vector<16x1xf32>
    %38 = vector.broadcast %30 : vector<16x1xf32> to vector<16x32xf32>
    %39 = arith.subf %26, %38 : vector<16x32xf32>
    %cst_18 = arith.constant 9.99999996E-13 : f32
    %40 = vector.broadcast %cst_18 : f32 to vector<16x1xf32>
    %41 = arith.addf %37, %40 : vector<16x1xf32>
    %42 = math.rsqrt %41 : vector<16x1xf32>
    %43 = vector.broadcast %42 : vector<16x1xf32> to vector<16x32xf32>
    %44 = arith.mulf %39, %43 : vector<16x32xf32>
    %c0_19 = arith.constant 0 : index
    %c0_20 = arith.constant 0 : index
    %45 = vector.load %arg6[%c0_19, %c0_20] : memref<1x32xf32, #tpu.memory_space<vmem>>, vector<1x32xf32>
    %46 = vector.broadcast %45 : vector<1x32xf32> to vector<16x32xf32>
    %47 = arith.mulf %44, %46 : vector<16x32xf32>
    %c0_21 = arith.constant 0 : index
    %c0_22 = arith.constant 0 : index
    %48 = vector.load %arg7[%c0_21, %c0_22] : memref<1x32xf32, #tpu.memory_space<vmem>>, vector<1x32xf32>
    %49 = vector.broadcast %48 : vector<1x32xf32> to vector<16x32xf32>
    %50 = arith.addf %47, %49 : vector<16x32xf32>
    %51 = arith.truncf %50 : vector<16x32xf32> to vector<16x32xbf16>
    %c0_23 = arith.constant 0 : index
    %c0_24 = arith.constant 0 : index
    %52 = vector.load %arg8[%c0_23, %c0_24] : memref<16x32xbf16, #tpu.memory_space<vmem>>, vector<16x32xbf16>
    tpu.vector_store %arg8[%c0_23, %c0_24], %51 {strides = array<i32>} : memref<16x32xbf16, #tpu.memory_space<vmem>>, vector<16x32xbf16>,
    return
  }
  func.func @transform_0(%arg0: i32) -> (i32, i32) {
    %c0_i32 = arith.constant 0 : i32
    %c0_i32_0 = arith.constant 0 : i32
    return %arg0, %c0_i32 : i32, i32
  }
  func.func @transform_1(%arg0: i32) -> (i32, i32) {
    %c0_i32 = arith.constant 0 : i32
    %c0_i32_0 = arith.constant 0 : i32
    %c0_i32_1 = arith.constant 0 : i32
    return %c0_i32, %c0_i32_0 : i32, i32
  }
  func.func @transform_2(%arg0: i32) -> (i32, i32) {
    %c0_i32 = arith.constant 0 : i32
    %c0_i32_0 = arith.constant 0 : i32
    %c0_i32_1 = arith.constant 0 : i32
    return %c0_i32, %c0_i32_0 : i32, i32
  }
  func.func @transform_3(%arg0: i32) -> (i32, i32) {
    %c0_i32 = arith.constant 0 : i32
    %c0_i32_0 = arith.constant 0 : i32
    %c0_i32_1 = arith.constant 0 : i32
    return %c0_i32, %c0_i32_0 : i32, i32
  }
  func.func @transform_4(%arg0: i32) -> (i32, i32) {
    %c0_i32 = arith.constant 0 : i32
    %c0_i32_0 = arith.constant 0 : i32
    %c0_i32_1 = arith.constant 0 : i32
    return %c0_i32, %c0_i32_0 : i32, i32
  }
  func.func @transform_5(%arg0: i32) -> (i32, i32) {
    %c0_i32 = arith.constant 0 : i32
    %c0_i32_0 = arith.constant 0 : i32
    %c0_i32_1 = arith.constant 0 : i32
    return %c0_i32, %c0_i32_0 : i32, i32
  }
  func.func @transform_6(%arg0: i32) -> (i32, i32) {
    %c0_i32 = arith.constant 0 : i32
    %c0_i32_0 = arith.constant 0 : i32
    %c0_i32_1 = arith.constant 0 : i32
    return %c0_i32, %c0_i32_0 : i32, i32
  }
  func.func @transform_7(%arg0: i32) -> (i32, i32) {
    %c0_i32 = arith.constant 0 : i32
    %c0_i32_0 = arith.constant 0 : i32
    return %arg0, %c0_i32 : i32, i32
  }
}

module attributes {stable_mosaic.version = 11 : i64} {
  func.func @_head_kernel(%arg0: i32, %arg1: i32, %arg2: memref<2x256xbf16, #tpu.memory_space<vmem>>, %arg3: memref<256x64xbf16, #tpu.memory_space<vmem>>, %arg4: memref<1x64xf32, #tpu.memory_space<vmem>>, %arg5: memref<64x128xbf16, #tpu.memory_space<vmem>>, %arg6: memref<1x128xf32, #tpu.memory_space<vmem>>, %arg7: memref<2x128xf32, #tpu.memory_space<vmem>>, %arg8: memref<2x64xf32, #tpu.memory_space<vmem>>) attributes {dimension_semantics = [#tpu.dimension_semantics<parallel>, #tpu.dimension_semantics<arbitrary>], iteration_bounds = array<i64: 1, 1>, scalar_prefetch = 0 : i64, scratch_operands = 1 : i64, tpu.core_type = #tpu.core_type<tc>, window_params = [{transform_indices = @transform_0, window_bounds = array<i64: 2, 256>}, {transform_indices = @transform_1, window_bounds = array<i64: 256, 64>}, {pipeline_mode = #tpu.pipeline_mode<synchronous>, transform_indices = @transform_2, window_bounds = array<i64: 1, 64>}, {pipeline_mode = #tpu.pipeline_mode<synchronous>, transform_indices = @transform_3, window_bounds = array<i64: 64, 128>}, {pipeline_mode = #tpu.pipeline_mode<synchronous>, transform_indices = @transform_4, window_bounds = array<i64: 1, 128>}, {transform_indices = @transform_5, window_bounds = array<i64: 2, 128>}]} {
    %c0_i32 = arith.constant 0 : i32
    %0 = arith.cmpi eq, %arg1, %c0_i32 : i32
    %1 = arith.extui %0 : i1 to i32
    %c0_i32_0 = arith.constant 0 : i32
    %2 = arith.cmpi ne, %1, %c0_i32_0 : i32
    scf.if %2 {
      %cst_10 = arith.constant 0.000000e+00 : f32
      %12 = vector.broadcast %cst_10 : f32 to vector<2x64xf32>
      %c0_11 = arith.constant 0 : index
      %c0_12 = arith.constant 0 : index
      %13 = vector.load %arg8[%c0_11, %c0_12] : memref<2x64xf32, #tpu.memory_space<vmem>>, vector<2x64xf32>
      tpu.vector_store %arg8[%c0_11, %c0_12], %12 {strides = array<i32>} : memref<2x64xf32, #tpu.memory_space<vmem>>, vector<2x64xf32>,
    } else {
    }
    %c0 = arith.constant 0 : index
    %c0_1 = arith.constant 0 : index
    %3 = vector.load %arg8[%c0, %c0_1] : memref<2x64xf32, #tpu.memory_space<vmem>>, vector<2x64xf32>
    %c0_2 = arith.constant 0 : index
    %c0_3 = arith.constant 0 : index
    %4 = vector.load %arg2[%c0_2, %c0_3] : memref<2x256xbf16, #tpu.memory_space<vmem>>, vector<2x256xbf16>
    %c0_4 = arith.constant 0 : index
    %c0_5 = arith.constant 0 : index
    %5 = vector.load %arg3[%c0_4, %c0_5] : memref<256x64xbf16, #tpu.memory_space<vmem>>, vector<256x64xbf16>
    %cst = arith.constant dense<0.000000e+00> : vector<2x64xf32>
    %6 = tpu.matmul %4, %5, %cst {dimension_numbers = #tpu.dot_dimension_numbers<[1], [0], [0], [1], [0, 0, 1, 1], [], []>} : vector<2x256xbf16>, vector<256x64xbf16>, vector<2x64xf32> -> vector<2x64xf32>
    %7 = arith.addf %3, %6 : vector<2x64xf32>
    %c0_6 = arith.constant 0 : index
    %c0_7 = arith.constant 0 : index
    %8 = vector.load %arg8[%c0_6, %c0_7] : memref<2x64xf32, #tpu.memory_space<vmem>>, vector<2x64xf32>
    tpu.vector_store %arg8[%c0_6, %c0_7], %7 {strides = array<i32>} : memref<2x64xf32, #tpu.memory_space<vmem>>, vector<2x64xf32>,
    %c0_i32_8 = arith.constant 0 : i32
    %9 = arith.cmpi eq, %arg1, %c0_i32_8 : i32
    %10 = arith.extui %9 : i1 to i32
    %c0_i32_9 = arith.constant 0 : i32
    %11 = arith.cmpi ne, %10, %c0_i32_9 : i32
    scf.if %11 {
      %c0_10 = arith.constant 0 : index
      %c0_11 = arith.constant 0 : index
      %12 = vector.load %arg8[%c0_10, %c0_11] : memref<2x64xf32, #tpu.memory_space<vmem>>, vector<2x64xf32>
      %c0_12 = arith.constant 0 : index
      %c0_13 = arith.constant 0 : index
      %13 = vector.load %arg4[%c0_12, %c0_13] : memref<1x64xf32, #tpu.memory_space<vmem>>, vector<1x64xf32>
      %14 = vector.broadcast %13 : vector<1x64xf32> to vector<2x64xf32>
      %15 = arith.addf %12, %14 : vector<2x64xf32>
      %cst_14 = arith.constant 0.000000e+00 : f32
      %16 = vector.broadcast %cst_14 : f32 to vector<2x64xf32>
      %17 = arith.maximumf %15, %16 : vector<2x64xf32>
      %18 = arith.truncf %17 : vector<2x64xf32> to vector<2x64xbf16>
      %c0_15 = arith.constant 0 : index
      %c0_16 = arith.constant 0 : index
      %19 = vector.load %arg5[%c0_15, %c0_16] : memref<64x128xbf16, #tpu.memory_space<vmem>>, vector<64x128xbf16>
      %cst_17 = arith.constant dense<0.000000e+00> : vector<2x128xf32>
      %20 = tpu.matmul %18, %19, %cst_17 {dimension_numbers = #tpu.dot_dimension_numbers<[1], [0], [0], [1], [0, 0, 1, 1], [], []>} : vector<2x64xbf16>, vector<64x128xbf16>, vector<2x128xf32> -> vector<2x128xf32>
      %c0_18 = arith.constant 0 : index
      %c0_19 = arith.constant 0 : index
      %21 = vector.load %arg6[%c0_18, %c0_19] : memref<1x128xf32, #tpu.memory_space<vmem>>, vector<1x128xf32>
      %22 = vector.broadcast %21 : vector<1x128xf32> to vector<2x128xf32>
      %23 = arith.addf %20, %22 : vector<2x128xf32>
      %c0_20 = arith.constant 0 : index
      %c0_21 = arith.constant 0 : index
      %24 = vector.load %arg7[%c0_20, %c0_21] : memref<2x128xf32, #tpu.memory_space<vmem>>, vector<2x128xf32>
      tpu.vector_store %arg7[%c0_20, %c0_21], %23 {strides = array<i32>} : memref<2x128xf32, #tpu.memory_space<vmem>>, vector<2x128xf32>,
    } else {
    }
    return
  }
  func.func @transform_0(%arg0: i32, %arg1: i32) -> (i32, i32) {
    %c0_i32 = arith.constant 0 : i32
    return %arg0, %arg1 : i32, i32
  }
  func.func @transform_1(%arg0: i32, %arg1: i32) -> (i32, i32) {
    %c0_i32 = arith.constant 0 : i32
    %c0_i32_0 = arith.constant 0 : i32
    return %arg1, %c0_i32 : i32, i32
  }
  func.func @transform_2(%arg0: i32, %arg1: i32) -> (i32, i32) {
    %c0_i32 = arith.constant 0 : i32
    %c0_i32_0 = arith.constant 0 : i32
    %c0_i32_1 = arith.constant 0 : i32
    return %c0_i32, %c0_i32_0 : i32, i32
  }
  func.func @transform_3(%arg0: i32, %arg1: i32) -> (i32, i32) {
    %c0_i32 = arith.constant 0 : i32
    %c0_i32_0 = arith.constant 0 : i32
    %c0_i32_1 = arith.constant 0 : i32
    return %c0_i32, %c0_i32_0 : i32, i32
  }
  func.func @transform_4(%arg0: i32, %arg1: i32) -> (i32, i32) {
    %c0_i32 = arith.constant 0 : i32
    %c0_i32_0 = arith.constant 0 : i32
    %c0_i32_1 = arith.constant 0 : i32
    return %c0_i32, %c0_i32_0 : i32, i32
  }
  func.func @transform_5(%arg0: i32, %arg1: i32) -> (i32, i32) {
    %c0_i32 = arith.constant 0 : i32
    %c0_i32_0 = arith.constant 0 : i32
    return %arg0, %c0_i32 : i32, i32
  }
}

</mosaic_0001>

<bundles_post_ra>
// kernel: bert_classifier_forward.10
= control target key start
LH: loop header
LB: loop body
LE: loop exit
PB: predicated region body
PF: predicated region fallthrough
CT: control target
= control target key end

     0   :  { %vm16_vm0 = vcmask 261120   ;;  %vm70_vm1 = vcmask 257024   ;;  %s129_s0 = inlined_call_operand.vmem [shape: f32[16,32], index: 0, kind: input, shape index: {}]   ;;  %s130_s1 = inlined_call_operand.vmem [shape: f32[1,32], index: 1, kind: input, shape index: {}]   ;;  %s131_s2 = inlined_call_operand.vmem [shape: f32[1,32], index: 2, kind: input, shape index: {}]   ;;  %s132_s3 = inlined_call_operand.vmem [shape: bf16[16,32], index: 3, kind: output, shape index: {}]  }
   0x1   :  { %v14_v0 = vld [vmem:[%s129_s0] sm:$0xff]  ;;  %v15_v1 = vld [vmem:[%s129_s0 + $0x8] sm:$0xff] }
   0x2   :  { %v17_v2 = vsel %vm16_vm0, %v14_v0, 0.0  ;;  %v20_v3 = vsel %vm16_vm0, %v15_v1, 0.0  ;;  %v77_v21 = vld [vmem:[%s130_s1] ss:$0 sm:$0xff] }
   0x3   :  { %18 = vadd.xlane.f32.xlu0 %v17_v2  ;;  %v78_v23 = vld [vmem:[%s131_s2] ss:$0 sm:$0xff] }
   0x7   :  { %21 = vadd.xlane.f32.xlu0 %v20_v3 }
  0x90   :  { %v19_v4 = vpop.xlane.xlu0 %18 }
  0x91   :  { %v24_v5 = vmul.f32 0.03125, %v19_v4 }
  0x93   :  { %v26_v6 = vsub.f32 %v14_v0, %v24_v5 }
  0x94   :  { %v22_v7 = vpop.xlane.xlu0 %21 }
  0x95   :  { %v25_v8 = vmul.f32 0.03125, %v22_v7  ;;  %v28_v9 = vmul.f32 %v26_v6, %v26_v6 }
  0x97   :  { %v27_v10 = vsub.f32 %v15_v1, %v25_v8  ;;  %v30_v11 = vsel %vm16_vm0, %v28_v9, 0.0 }
  0x98   :  { %31 = vadd.xlane.f32.xlu1 %v30_v11 }
  0x99   :  { %v29_v12 = vmul.f32 %v27_v10, %v27_v10 }
  0x9b   :  { %v33_v13 = vsel %vm16_vm0, %v29_v12, 0.0 }
  0x9c   :  { %34 = vadd.xlane.f32.xlu1 %v33_v13 }
 0x125   :  { %v32_v14 = vpop.xlane.xlu1 %31 }
 0x126   :  { %v36_v15 = vmul.f32 0.03125, %v32_v14 }
 0x128   :  { %v38_v16 = vadd.f32 1e-12, %v36_v15 }
 0x129   :  { %v35_v17 = vpop.xlane.xlu1 %34 }
 0x12a   :  { %83 = vrsqrt.f32 %v38_v16  ;;  %v37_v18 = vmul.f32 0.03125, %v35_v17 }
 0x12c   :  { %v39_v19 = vadd.f32 1e-12, %v37_v18 }
 0x12e   :  { %85 = vrsqrt.f32 %v39_v19 }
 0x134   :  { %v84_v20 = vpop.eup %83 }
 0x135   :  { %v42_v22 = vmul.f32 %v84_v20, %v26_v6 }
 0x137   :  { %v51_v24 = vmul.f32 %v77_v21, %v42_v22 }
 0x138   :  { %v86_v25 = vpop.eup %85 }
 0x139   :  { %v60_v26 = vadd.f32 %v78_v23, %v51_v24  ;;  %v43_v27 = vmul.f32 %v86_v25, %v27_v10 }
 0x13b   :  { %v81_v28 = vpack.c.bf16 %v60_v26, %v60_v26  ;;  %v52_v29 = vmul.f32 %v77_v21, %v43_v27 }
 0x13d   :  { %71 = vst.msk [vmem:[%s132_s3] sm:$0xf] %vm70_vm1, %v81_v28  ;;  %v61_v30 = vadd.f32 %v78_v23, %v52_v29 }
 0x13f   :  { %v82_v31 = vpack.c.bf16 %v61_v30, %v61_v30 }
 0x141   :  { %72 = vst.msk [vmem:[%s132_s3 + $0x4] sm:$0xf] %vm70_vm1, %v82_v31 }

// kernel: bert_classifier_forward.11
= control target key start
LH: loop header
LB: loop body
LE: loop exit
PB: predicated region body
PF: predicated region fallthrough
CT: control target
= control target key end

     0   :  { %v130_v0 = vmov 0.0   ;;  %vm131_vm0 = vmmov 0   ;;  %vm45_vm1 = vcmask 261120   ;;  %vm98_vm2 = vcmask 781312   ;;  %s170_s1 = inlined_call_operand.vmem [shape: bf16[32,96], index: 1, kind: input, shape index: {}]   ;;  %s171_s0 = inlined_call_operand.vmem [shape: bf16[16,32], index: 0, kind: input, shape index: {}]   ;;  %s172_s2 = inlined_call_operand.vmem [shape: f32[1,96], index: 2, kind: input, shape index: {}]   ;;  %s173_s3 = inlined_call_operand.vmem [shape: bf16[16,96], index: 3, kind: output, shape index: {}]  }
   0x1   :  { %117 = vmatprep.subr.bf16.mxu0 %v130_v0  ;;  %v127_v1 = vld [vmem:[%s170_s1] sm:$0xff]   ;;  %121 = vmatprep.mubr.msk.bf16.mxu0 %vm131_vm0, %v130_v0  ;;  %v128_v2 = vld [vmem:[%s170_s1 + $0x8] sm:$0xff]  }
   0x2   :  { %118 = vmatpush3.bf16.msra.mxu0 %v127_v1  ;;  %v129_v3 = vld [vmem:[%s171_s0] sm:$0xff]  }
   0x3   :  { %119 = vmatprep.subr.bf16.mxu0 %v130_v0  ;;  %v105_v4 = vld [vmem:[%s172_s2] ss:$0 sm:$0xff] }
   0x6   :  { %120 = vmatpush3.bf16.msra.mxu0 %v128_v2 }
   0x9   :  { %122 = vmatmul.mubr.msk.bf16.vlgmr.msra.gmra.mrb[0].mxu0 %vm45_vm1, %v129_v3 }
  0xdc   :  { %v83_v5 = vpop.f32.mrb[0].mxu0 }
  0xdd   :  { %v84_v6 = vadd.f32 %v105_v4, %v83_v5  ;;  %v123_v7 = vpop.f32.mrb[1].mxu0 }
  0xde   :  { %v86_v8 = vpop.f32.mrb[2].mxu0 }
  0xdf   :  { %v112_v9 = vpack.c.bf16 %v84_v6, %v84_v6  ;;  %v87_v10 = vadd.f32 %v105_v4, %v86_v8  ;;  %v124_v11 = vpop.f32.mrb[3].mxu0 }
  0xe1   :  { %99 = vst.msk [vmem:[%s173_s3] sm:$0xf] %vm98_vm2, %v112_v9  ;;  %v113_v12 = vpack.c.bf16 %v87_v10, %v87_v10 }
  0xe3   :  { %100 = vst.msk [vmem:[%s173_s3 + $0x4] sm:$0xf] %vm98_vm2, %v113_v12 }

// kernel: bert_classifier_forward.12
= control target key start
LH: loop header
LB: loop body
LE: loop exit
PB: predicated region body
PF: predicated region fallthrough
CT: control target
= control target key end

     0   :  { %s705_s15 = smov 0   ;;  %s707_s16 = smov 0   ;;  %s776_s0 = inlined_call_operand.vmem [shape: bf16[4,2,8,8], index: 0, kind: input, shape index: {}]   ;;  %s777_s1 = inlined_call_operand.vmem [shape: bf16[4,2,8,8], index: 1, kind: input, shape index: {}]   ;;  %s778_s2 = inlined_call_operand.vmem [shape: bf16[4,2,8,8], index: 2, kind: input, shape index: {}]   ;;  %s779_s3 = inlined_call_operand.vmem [shape: f32[2,1,8], index: 3, kind: input, shape index: {}]   ;;  %s780_s4 = inlined_call_operand.vmem [shape: bf16[4,2,8,8], index: 4, kind: output, shape index: {}]  }
   0x1   :  { %s709_s17 = smov 0   ;;  %s711_s18 = smov 0  }
   0x2   :  { %s713_s19 = smov 0  }
   0x3 LB: > { %s23_s20 = sadd.s32 1, %s668_s17  ;;  %s26_s21 = sadd.s32 1, %s672_s18  ;;  %s676_s19 = sphi %s713_s19, %s14_s19   ;;  %s672_s18 = sphi %s711_s18, %s784_s18   ;;  %s668_s17 = sphi %s709_s17, %s783_s17   ;;  %s664_s16 = sphi %s707_s16, %s782_s16   ;;  %s660_s15 = sphi %s705_s15, %s781_s15  }
   0x4   : > { %p24_p0 = scmp.ge.s32.totalorder %s23_s20, 4  ;;  %p562_p1 = scmp.ge.s32.totalorder %s676_s19, 1 }
   0x5   : > { %p219_p2 = scmp.lt.s32.totalorder %s676_s19, 9 }
   0x6   : > { %s786_s20 = smov (%p24_p0, %s23_s20), 0  ;;  %s788_s21 = smov (!%p24_p0, %s26_s21), %s672_s18 }
   0x7   : > { %p220_p3 = pnand %p562_p1, %p219_p2  ;;  %p28_p4 = scmp.ge.s32.totalorder %s788_s21, 2 }
   0x8   : > { %p270_p5 = scmp.lt.s32.totalorder (!%p220_p3), %s660_s15, 3  ;;  %p272_p6 = scmp.lt.s32.totalorder (!%p220_p3), %s664_s16, 1  ;;  %v678_v0 = vmov (!%p220_p3), 0.0   ;;  %vm679_vm0 = vmmov (!%p220_p3), 0   ;;  %vm318_vm1 = vcmask (!%p220_p3), 64512   ;;  %vm378_vm2 = vcmask (!%p220_p3), 1043456  }
   0x9   : > { %s790_s21 = smov (%p28_p4, %s788_s21), 0  ;;  %223 = sbr.rel (%p220_p3) target bundleno = 621 (0x26d), region = 36 }
   0xa   : > { %580 = vmatprep.subr.bf16.mxu0 (!%p220_p3), %v678_v0  ;;  %582 = vmatprep.mubr.msk.bf16.mxu0 (!%p220_p3), %vm679_vm0, %v678_v0  ;;  %vm425_vm3 = vcmask (!%p220_p3), 60416  }
   0xb   : > { %586 = vmatprep.subr.bf16.mxu1 (!%p220_p3), %v678_v0  ;;  %588 = vmatprep.mubr.msk.bf16.mxu1 (!%p220_p3), %vm679_vm0, %v678_v0 }
  0x10   : > { %s792_s15 = smov (!%p270_p5, %s660_s15), 3  ;;  %s794_s16 = smov (!%p272_p6, %s664_s16), 1 }
  0x11   : > { %s563_s22 = sshll.u32 %s792_s15, 1  ;;  %s296_s7 = scalar_lea.vmem %s779_s3, %s794_s16 }
  0x12   : > { %s275_s23 = sadd.s32 %s563_s22, %s794_s16  ;;  %v571_v5 = vld [vmem:[%s296_s7] ss:$0 sm:$0xff] }
  0x13   : > { %s735_s24 = sshll.u32 %s275_s23, 2 }
  0x14   : > { %s285_s27 = scalar_lea.vmem %s777_s1, %s735_s24  ;;  %s277_s30 = scalar_lea.vmem %s776_s0, %s735_s24 }
  0x15   : > { %v309_v1 = vld [vmem:[%s285_s27] sm:$0xf]  ;;  %s293_s10 = scalar_lea.vmem %s778_s2, %s735_s24  ;;  %s304_s13 = scalar_lea.vmem %s780_s4, %s735_s24 }
  0x16   : > { %v323_v2 = vsel %vm318_vm1, %v309_v1, 0  ;;  %v307_v3 = vld [vmem:[%s277_s30] sm:$0xf] }
  0x17   : > { %581 = vmatpush3.bf16.xpose.msra.mxu0 %v323_v2  ;;  %v308_v4 = vmul.bf16 1052065461, %v307_v3  ;;  %v310_v12 = vld [vmem:[%s293_s10] sm:$0xf] }
  0x18   : > { %v380_v13 = vsel %vm378_vm2, %v310_v12, 0 }
  0x19   : > { %587 = vmatpush3.bf16.msra.mxu1 %v380_v13 }
  0x1e   : > { %583 = vmatmul.mubr.msk.bf16.vlgmr.msra.gmra.mrb[0].mxu0 %vm318_vm1, %v308_v4 }
  0xf1   : > { %v359_v6 = vpop.f32.mrb[0].mxu0 }
  0xf2   : > { %v360_v7 = vadd.f32 %v571_v5, %v359_v6  ;;  %v584_v8 = vpop.f32.mrb[1].mxu0 }
  0xf3   : > { %v362_v9 = vpop.f32.mrb[2].mxu0 }
  0xf4   : > { %v585_v10 = vpop.f32.mrb[3].mxu0  ;;  %v365_v11 = vsel %vm318_vm1, %v360_v7, -inf }
  0xf5   : > { %366 = vmax.xlane.f32.xlu0 %v365_v11 }
 0x182   : > { %v367_v14 = vpop.xlane.xlu0 %366 }
 0x183   : > { %v368_v15 = vsub.f32 %v360_v7, %v367_v14 }
 0x185   : > { %v369_v16 = vmul.f32 1.442695, %v368_v15 }
 0x187   : > { %634 = vpow2.f32 %v369_v16 }
 0x191   : > { %v635_v17 = vpop.eup %634 }
 0x192   : > { %v371_v18 = vsel %vm318_vm1, %v635_v17, 0.0  ;;  %v374_v19 = vpack.c.bf16 %v635_v17, %v635_v17 }
 0x193   : > { %372 = vadd.xlane.f32.xlu0 %v371_v18 }
 0x194   : > { %589 = vmatmul.mubr.msk.bf16.vlgmr.msra.gmra.mrb[0].mxu1 %vm318_vm1, %v374_v19 }
 0x220   : > { %v373_v20 = vpop.xlane.xlu0 %372 }
 0x221   : > { %636 = vrcp.f32 %v373_v20 }
 0x22b   : > { %v637_v21 = vpop.eup %636 }
 0x267   : > { %v416_v22 = vpop.f32.mrb[0].mxu1 }
 0x268   : > { %v423_v23 = vmul.f32 %v637_v21, %v416_v22  ;;  %v590_v24 = vpop.f32.mrb[1].mxu1 }
 0x269   : > { %v419_v25 = vpop.f32.mrb[2].mxu1 }
 0x26a   : > { %v424_v26 = vpack.c.bf16 %v423_v23, %v423_v23  ;;  %v591_v27 = vpop.f32.mrb[3].mxu1 }
 0x26c   : > { %426 = vst.msk [vmem:[%s304_s13] sm:$0xf] %vm425_vm3, %v424_v26 }
 0x26d PF: > { %s14_s19 = sadd.s32 1, %s676_s19   ;;  %s781_s15 = smov %s668_s17 }
 0x26e   : > { %p11_p7 = scmp.ge.s32.totalorder %s14_s19, 10   ;;  %s782_s16 = smov %s672_s18 }
 0x26f   : > { %s783_s17 = smov %s786_s20  ;;  %s784_s18 = smov %s790_s21 }
 0x270   :  { %13 = sbr.rel (!%p11_p7) target bundleno = 3 (0x3), region = 75 }

// kernel: bert_classifier_forward.13
= control target key start
LH: loop header
LB: loop body
LE: loop exit
PB: predicated region body
PF: predicated region fallthrough
CT: control target
= control target key end

     0   :  { %s694_s21 = smov 0   ;;  %s696_s22 = smov 0   ;;  %s757_s0 = inlined_call_operand.vmem [shape: bf16[4,16,8], index: 0, kind: input, shape index: {}]   ;;  %s758_s1 = inlined_call_operand.vmem [shape: bf16[4,8,32], index: 1, kind: input, shape index: {}]   ;;  %s759_s2 = inlined_call_operand.vmem [shape: f32[1,32], index: 2, kind: input, shape index: {}]   ;;  %s760_s3 = inlined_call_operand.vmem [shape: bf16[16,32], index: 3, kind: input, shape index: {}]   ;;  %s761_s4 = inlined_call_operand.vmem [shape: f32[1,32], index: 4, kind: input, shape index: {}]   ;;  %s762_s5 = inlined_call_operand.vmem [shape: f32[1,32], index: 5, kind: input, shape index: {}]   ;;  %s763_s6 = inlined_call_operand.vmem [shape: bf16[16,32], index: 6, kind: output, shape index: {}]  }
   0x1   :  { %s698_s23 = smov 0  }
   0x2 LB: > { %s25_s24 = sadd.s32 1, %s650_s22  ;;  %p568_p0 = scmp.ge.s32.totalorder %s654_s23, 1  ;;  %s654_s23 = sphi %s698_s23, %s16_s23   ;;  %s650_s22 = sphi %s696_s22, %s765_s22   ;;  %s646_s21 = sphi %s694_s21, %s764_s21  }
   0x3   : > { %p26_p1 = scmp.ge.s32.totalorder %s25_s24, 4  ;;  %p251_p2 = scmp.lt.s32.totalorder %s654_s23, 5 }
   0x5   : > { %s767_s24 = smov (%p26_p1, %s25_s24), 0  ;;  %p252_p3 = pnand %p568_p0, %p251_p2 }
   0x6   : > { %p295_p4 = scmp.lt.s32.totalorder (!%p252_p3), %s646_s21, 3  ;;  %p572_p5 = scmp.ne.s32.totalorder (!%p252_p3), %s646_s21, 0 }
   0x7   : > { %255 = sbr.rel (%p252_p3) target bundleno = 573 (0x23d), region = 44 }
   0xe   : > { %s296_s25 = scalar_select %p295_p4, %s646_s21, 3 }
   0xf   : > { %324 = sbr.rel (%p572_p5) target bundleno = 22 (0x16), region = 48  ;;  %vm325_vm0 = vcmask (!%p572_p5), 261120   ;;  %v656_v0 = vmov (!%p572_p5), 0.0  }
  0x10   : > { %s585_s26 = sshll.u32 %s296_s25, 3  ;;  %s571_s27 = sshll.u32 %s296_s25, 2  ;;  %326 = vst.msk [vmem:[#allocation2] sm:$0xff] (!%p572_p5), %vm325_vm0, %v656_v0  ;;  %327 = vst.msk [vmem:[#allocation2 + $0x8] sm:$0xff] (!%p572_p5), %vm325_vm0, %v656_v0 }
  0x11   : > { %s302_s30 = scalar_lea.vmem %s757_s0, %s585_s26  ;;  %s307_s9 = scalar_lea.vmem %s758_s1, %s571_s27 }
  0x16 PF: > { %v332_v1 = vld [vmem:[%s307_s9] sm:$0xf]  ;;  %vm342_vm1 = vcmask 1043456   ;;  %v657_v2 = vmov 0.0   ;;  %vm658_vm2 = vmmov 0   ;;  %vm338_vm3 = vcmask 64512  }
  0x17   : > { %594 = vmatprep.subr.bf16.mxu0 %v657_v2  ;;  %v344_v3 = vsel %vm342_vm1, %v332_v1, 0  ;;  %596 = vmatprep.mubr.msk.bf16.mxu0 %vm658_vm2, %v657_v2  ;;  %v627_v4 = vld [vmem:[%s302_s30] sm:$0xff]   ;;  %vm389_vm4 = vcmask 261120   ;;  %v329_v7 = vld [vmem:[#allocation2 + $0x8] sm:$0xff]  ;;  %p575_p6 = scmp.ne.s32.totalorder %s646_s21, 3 }
  0x18   : > { %595 = vmatpush3.bf16.msra.mxu0 %v344_v3  ;;  %v328_v5 = vld [vmem:[#allocation2] sm:$0xff]  ;;  %vm466_vm5 = vcmask (!%p575_p6), 257024  }
  0x19   : > { %v576_v14 = vld [vmem:[%s759_s2] ss:$0 sm:$0xff] (!%p575_p6) }
  0x1a   : > { %v589_v15 = vld [vmem:[%s760_s3] sm:$0xff] (!%p575_p6)  }
  0x1b   : > { %597 = vmatmul.mubr.msk.bf16.vlgmr.msra.gmra.mrb[0].mxu0 %vm338_vm3, %v627_v4  ;;  %v590_v17 = vunpack.c.l.bf16 (!%p575_p6), %v589_v15  ;;  %v591_v19 = vunpack.c.h.bf16 (!%p575_p6), %v589_v15  ;;  %v577_v42 = vld [vmem:[%s761_s4] ss:$0 sm:$0xff] (!%p575_p6) }
  0x1c   : > { %v578_v44 = vld [vmem:[%s762_s5] ss:$0 sm:$0xff] (!%p575_p6) }
  0xed   : > { %395 = sbr.rel (%p575_p6) target bundleno = 573 (0x23d), region = 52 }
  0xee   : > { %v380_v6 = vpop.f32.mrb[0].mxu0 }
  0xef   : > { %v387_v8 = vadd.f32 %v380_v6, %v328_v5  ;;  %v598_v9 = vpop.f32.mrb[1].mxu0 }
  0xf0   : > { %v383_v10 = vpop.f32.mrb[2].mxu0 }
  0xf1   : > { %390 = vst.msk [vmem:[#allocation2] sm:$0xff] %vm389_vm4, %v387_v8  ;;  %v388_v11 = vadd.f32 %v383_v10, %v329_v7  ;;  %v599_v12 = vpop.f32.mrb[3].mxu0 }
  0xf3   : > { %391 = vst.msk [vmem:[#allocation2 + $0x8] sm:$0xff] %vm389_vm4, %v388_v11 }
  0xf8   : > { %v396_v13 = vld [vmem:[#allocation2] sm:$0xff] }
  0xf9   : > { %v405_v16 = vadd.f32 %v576_v14, %v396_v13 }
  0xfa   : > { %v397_v18 = vld [vmem:[#allocation2 + $0x8] sm:$0xff] }
  0xfb   : > { %v406_v20 = vadd.f32 %v576_v14, %v397_v18  ;;  %v411_v21 = vadd.f32 %v590_v17, %v405_v16 }
  0xfd   : > { %v412_v22 = vadd.f32 %v591_v19, %v406_v20  ;;  %v413_v23 = vsel %vm389_vm4, %v411_v21, 0.0 }
  0xfe   : > { %414 = vadd.xlane.f32.xlu0 %v413_v23 }
  0xff   : > { %v416_v24 = vsel %vm389_vm4, %v412_v22, 0.0 }
 0x102   : > { %417 = vadd.xlane.f32.xlu0 %v416_v24 }
 0x18b   : > { %v415_v25 = vpop.xlane.xlu0 %414 }
 0x18c   : > { %v420_v26 = vmul.f32 0.03125, %v415_v25 }
 0x18e   : > { %v422_v27 = vsub.f32 %v411_v21, %v420_v26 }
 0x18f   : > { %v418_v28 = vpop.xlane.xlu0 %417 }
 0x190   : > { %v421_v29 = vmul.f32 0.03125, %v418_v28  ;;  %v424_v30 = vmul.f32 %v422_v27, %v422_v27 }
 0x192   : > { %v423_v31 = vsub.f32 %v412_v22, %v421_v29  ;;  %v426_v32 = vsel %vm389_vm4, %v424_v30, 0.0 }
 0x193   : > { %427 = vadd.xlane.f32.xlu1 %v426_v32 }
 0x194   : > { %v425_v33 = vmul.f32 %v423_v31, %v423_v31 }
 0x196   : > { %v429_v34 = vsel %vm389_vm4, %v425_v33, 0.0 }
 0x197   : > { %430 = vadd.xlane.f32.xlu1 %v429_v34 }
 0x220   : > { %v428_v35 = vpop.xlane.xlu1 %427 }
 0x221   : > { %v432_v36 = vmul.f32 0.03125, %v428_v35 }
 0x223   : > { %v434_v37 = vadd.f32 1e-12, %v432_v36 }
 0x224   : > { %v431_v38 = vpop.xlane.xlu1 %430 }
 0x225   : > { %628 = vrsqrt.f32 %v434_v37  ;;  %v433_v39 = vmul.f32 0.03125, %v431_v38 }
 0x227   : > { %v435_v40 = vadd.f32 1e-12, %v433_v39 }
 0x229   : > { %630 = vrsqrt.f32 %v435_v40 }
 0x22f   : > { %v629_v41 = vpop.eup %628 }
 0x230   : > { %v438_v43 = vmul.f32 %v629_v41, %v422_v27 }
 0x232   : > { %v447_v45 = vmul.f32 %v577_v42, %v438_v43 }
 0x233   : > { %v631_v46 = vpop.eup %630 }
 0x234   : > { %v456_v47 = vadd.f32 %v578_v44, %v447_v45  ;;  %v439_v48 = vmul.f32 %v631_v46, %v423_v31 }
 0x236   : > { %v586_v49 = vpack.c.bf16 %v456_v47, %v456_v47  ;;  %v448_v50 = vmul.f32 %v577_v42, %v439_v48 }
 0x238   : > { %467 = vst.msk [vmem:[%s763_s6] sm:$0xf] %vm466_vm5, %v586_v49  ;;  %v457_v51 = vadd.f32 %v578_v44, %v448_v50 }
 0x23a   : > { %v587_v52 = vpack.c.bf16 %v457_v51, %v457_v51 }
 0x23c   : > { %468 = vst.msk [vmem:[%s763_s6 + $0x4] sm:$0xf] %vm466_vm5, %v587_v52 }
 0x23d PF: > { %s16_s23 = sadd.s32 1, %s654_s23   ;;  %s764_s21 = smov %s650_s22 }
 0x23e   : > { %p13_p7 = scmp.ge.s32.totalorder %s16_s23, 6   ;;  %s765_s22 = smov %s767_s24 }
 0x240   :  { %15 = sbr.rel (!%p13_p7) target bundleno = 2 (0x2), region = 88 }

// kernel: bert_classifier_forward.14
= control target key start
LH: loop header
LB: loop body
LE: loop exit
PB: predicated region body
PF: predicated region fallthrough
CT: control target
= control target key end

     0   :  { %v332_v0 = vmov 0.0   ;;  %vm333_vm0 = vmmov 0   ;;  %vm57_vm1 = vcmask 261120   ;;  %vm160_vm2 = vcmask 523264   ;;  %s418_s1 = inlined_call_operand.vmem [shape: bf16[32,64], index: 1, kind: input, shape index: {}]   ;;  %s419_s0 = inlined_call_operand.vmem [shape: bf16[16,32], index: 0, kind: input, shape index: {}]   ;;  %s420_s3 = inlined_call_operand.vmem [shape: bf16[64,32], index: 3, kind: input, shape index: {}]   ;;  %s421_s2 = inlined_call_operand.vmem [shape: f32[1,64], index: 2, kind: input, shape index: {}]   ;;  %s422_s4 = inlined_call_operand.vmem [shape: f32[1,32], index: 4, kind: input, shape index: {}]   ;;  %s423_s5 = inlined_call_operand.vmem [shape: f32[1,32], index: 5, kind: input, shape index: {}]   ;;  %s424_s6 = inlined_call_operand.vmem [shape: f32[1,32], index: 6, kind: input, shape index: {}]   ;;  %s425_s7 = inlined_call_operand.vmem [shape: bf16[16,32], index: 7, kind: output, shape index: {}]  }
   0x1   :  { %294 = vmatprep.subr.bf16.mxu0 %v332_v0  ;;  %v316_v1 = vld [vmem:[%s418_s1] sm:$0xff]   ;;  %298 = vmatprep.mubr.msk.bf16.mxu0 %vm333_vm0, %v332_v0  ;;  %v317_v2 = vld [vmem:[%s418_s1 + $0x8] sm:$0xff]   ;;  %v321_v6 = vld [vmem:[%s420_s3 + $0x10] sm:$0xff]   ;;  %vm262_vm3 = vcmask 257024  }
   0x2   :  { %302 = vmatprep.subr.bf16.mxu1 %v332_v0  ;;  %310 = vmatprep.mubr.msk.bf16.mxu1 %vm333_vm0, %v332_v0  ;;  %v27_v3 = vld [vmem:[%s419_s0] sm:$0xff]   ;;  %v320_v5 = vld [vmem:[%s420_s3 + $0x8] sm:$0xff]   ;;  %v322_v7 = vld [vmem:[%s420_s3 + $0x18] sm:$0xff]  }
   0x3   :  { %295 = vmatpush3.bf16.msra.mxu0 %v316_v1  ;;  %v319_v4 = vld [vmem:[%s420_s3] sm:$0xff]   ;;  %v205_v35 = vunpack.c.l.bf16 %v27_v3  ;;  %v206_v39 = vunpack.c.h.bf16 %v27_v3 }
   0x4   :  { %296 = vmatprep.subr.bf16.mxu0 %v332_v0  ;;  %303 = vmatpush3.bf16.msra.mxu1 %v319_v4  ;;  %v269_v8 = vld [vmem:[%s421_s2] ss:$0 sm:$0xff] }
   0x5   :  { %304 = vmatprep.subr.bf16.mxu1 %v332_v0  ;;  %v274_v34 = vld [vmem:[%s422_s4] ss:$0 sm:$0xff] }
   0x7   :  { %297 = vmatpush3.bf16.msra.mxu0 %v317_v2  ;;  %v281_v2 = vld [vmem:[%s424_s6] ss:$0 sm:$0xff] }
   0x8   :  { %305 = vmatpush3.bf16.msra.mxu1 %v320_v5 }
   0x9   :  { %306 = vmatprep.subr.bf16.mxu1 %v332_v0 }
   0xa   :  { %299 = vmatmul.mubr.msk.bf16.vlgmr.msra.gmra.mrb[0].mxu0 %vm57_vm1, %v27_v3 }
   0xc   :  { %307 = vmatpush3.bf16.msra.mxu1 %v321_v6 }
   0xd   :  { %308 = vmatprep.subr.bf16.mxu1 %v332_v0  ;;  %v280_v0 = vld [vmem:[%s423_s5] ss:$0 sm:$0xff] }
  0x10   :  { %309 = vmatpush3.bf16.msra.mxu1 %v322_v7 }
  0xdd   :  { %v95_v9 = vpop.f32.mrb[0].mxu0 }
  0xde   :  { %v96_v10 = vadd.f32 %v269_v8, %v95_v9  ;;  %v300_v11 = vpop.f32.mrb[1].mxu0 }
  0xdf   :  { %v98_v12 = vpop.f32.mrb[2].mxu0 }
  0xe0   :  { %v102_v13 = vmul.f32 %v96_v10, %v96_v10  ;;  %v99_v14 = vadd.f32 %v269_v8, %v98_v12  ;;  %v301_v15 = vpop.f32.mrb[3].mxu0 }
  0xe2   :  { %v104_v16 = vmul.f32 %v102_v13, %v96_v10  ;;  %v103_v17 = vmul.f32 %v99_v14, %v99_v14 }
  0xe4   :  { %v106_v18 = vmul.f32 0.044715, %v104_v16  ;;  %v105_v19 = vmul.f32 %v103_v17, %v99_v14 }
  0xe6   :  { %v108_v20 = vadd.f32 %v106_v18, %v96_v10  ;;  %v107_v21 = vmul.f32 0.044715, %v105_v19 }
  0xe8   :  { %v110_v22 = vmul.f32 0.7978846, %v108_v20  ;;  %v109_v23 = vadd.f32 %v107_v21, %v99_v14 }
  0xea   :  { %324 = vtanh.f32 %v110_v22  ;;  %v111_v24 = vmul.f32 0.7978846, %v109_v23 }
  0xec   :  { %326 = vtanh.f32 %v111_v24 }
  0xf4   :  { %v325_v25 = vpop.eup %324 }
  0xf5   :  { %v114_v26 = vadd.f32 1.0, %v325_v25 }
  0xf6   :  { %v327_v27 = vpop.eup %326 }
  0xf7   :  { %v116_v28 = vmul.f32 0.5, %v114_v26  ;;  %v115_v29 = vadd.f32 1.0, %v327_v27 }
  0xf9   :  { %v117_v30 = vmul.f32 0.5, %v115_v29  ;;  %v118_v31 = vmul.f32 %v116_v28, %v96_v10 }
  0xfb   :  { %v119_v32 = vmul.f32 %v117_v30, %v99_v14 }
  0xfd   :  { %v120_v33 = vpack.c.bf16 %v119_v32, %v118_v31 }
  0xff   :  { %311 = vmatmul.mubr.msk.bf16.vlgmr.msra.gmra.mrb[0].mxu1 %vm160_vm2, %v120_v33 }
 0x1d2   :  { %v198_v36 = vpop.f32.mrb[0].mxu1 }
 0x1d3   :  { %v199_v37 = vadd.f32 %v274_v34, %v198_v36  ;;  %v312_v38 = vpop.f32.mrb[1].mxu1 }
 0x1d4   :  { %v201_v40 = vpop.f32.mrb[2].mxu1 }
 0x1d5   :  { %v202_v41 = vadd.f32 %v274_v34, %v201_v40  ;;  %v313_v42 = vpop.f32.mrb[3].mxu1  ;;  %v207_v43 = vadd.f32 %v205_v35, %v199_v37 }
 0x1d7   :  { %v209_v44 = vsel %vm57_vm1, %v207_v43, 0.0  ;;  %v208_v45 = vadd.f32 %v206_v39, %v202_v41 }
 0x1d8   :  { %210 = vadd.xlane.f32.xlu0 %v209_v44 }
 0x1d9   :  { %v212_v46 = vsel %vm57_vm1, %v208_v45, 0.0 }
 0x1dc   :  { %213 = vadd.xlane.f32.xlu0 %v212_v46 }
 0x265   :  { %v211_v47 = vpop.xlane.xlu0 %210 }
 0x266   :  { %v216_v48 = vmul.f32 0.03125, %v211_v47 }
 0x268   :  { %v218_v49 = vsub.f32 %v207_v43, %v216_v48 }
 0x269   :  { %v214_v50 = vpop.xlane.xlu0 %213 }
 0x26a   :  { %v217_v51 = vmul.f32 0.03125, %v214_v50  ;;  %v220_v52 = vmul.f32 %v218_v49, %v218_v49 }
 0x26c   :  { %v219_v53 = vsub.f32 %v208_v45, %v217_v51  ;;  %v222_v54 = vsel %vm57_vm1, %v220_v52, 0.0 }
 0x26d   :  { %223 = vadd.xlane.f32.xlu1 %v222_v54 }
 0x26e   :  { %v221_v55 = vmul.f32 %v219_v53, %v219_v53 }
 0x270   :  { %v225_v56 = vsel %vm57_vm1, %v221_v55, 0.0 }
 0x271   :  { %226 = vadd.xlane.f32.xlu1 %v225_v56 }
 0x2fa   :  { %v224_v57 = vpop.xlane.xlu1 %223 }
 0x2fb   :  { %v228_v58 = vmul.f32 0.03125, %v224_v57 }
 0x2fd   :  { %v230_v59 = vadd.f32 1e-12, %v228_v58 }
 0x2fe   :  { %v227_v60 = vpop.xlane.xlu1 %226 }
 0x2ff   :  { %328 = vrsqrt.f32 %v230_v59  ;;  %v229_v61 = vmul.f32 0.03125, %v227_v60 }
 0x301   :  { %v231_v62 = vadd.f32 1e-12, %v229_v61 }
 0x303   :  { %330 = vrsqrt.f32 %v231_v62 }
 0x309   :  { %v329_v63 = vpop.eup %328 }
 0x30a   :  { %v234_v1 = vmul.f32 %v329_v63, %v218_v49 }
 0x30c   :  { %v243_v3 = vmul.f32 %v280_v0, %v234_v1 }
 0x30d   :  { %v331_v4 = vpop.eup %330 }
 0x30e   :  { %v252_v5 = vadd.f32 %v281_v2, %v243_v3  ;;  %v235_v6 = vmul.f32 %v331_v4, %v219_v53 }
 0x310   :  { %v284_v7 = vpack.c.bf16 %v252_v5, %v252_v5  ;;  %v244_v8 = vmul.f32 %v280_v0, %v235_v6 }
 0x312   :  { %263 = vst.msk [vmem:[%s425_s7] sm:$0xf] %vm262_vm3, %v284_v7  ;;  %v253_v9 = vadd.f32 %v281_v2, %v244_v8 }
 0x314   :  { %v285_v10 = vpack.c.bf16 %v253_v9, %v253_v9 }
 0x316   :  { %264 = vst.msk [vmem:[%s425_s7 + $0x4] sm:$0xf] %vm262_vm3, %v285_v10 }

// kernel: bert_classifier_forward.19
= control target key start
LH: loop header
LB: loop body
LE: loop exit
PB: predicated region body
PF: predicated region fallthrough
CT: control target
= control target key end

     0   :  { %v74_v8 = vlaneseq  ;;  %v449_v15 = vmov 1966171168   ;;  %s566_s0 = inlined_call_operand.vmem [shape: bf16[2,256], index: 0, kind: input, shape index: {}]   ;;  %s567_s1 = inlined_call_operand.vmem [shape: bf16[256,64], index: 1, kind: input, shape index: {}]   ;;  %s568_s2 = inlined_call_operand.vmem [shape: f32[1,64], index: 2, kind: input, shape index: {}]   ;;  %s569_s3 = inlined_call_operand.vmem [shape: bf16[64,128], index: 3, kind: input, shape index: {}]   ;;  %s570_s4 = inlined_call_operand.vmem [shape: f32[1,128], index: 4, kind: input, shape index: {}]   ;;  %s571_s5 = inlined_call_operand.hbm [shape: f32[2,128], index: 5, kind: output, shape index: {}]  }
   0x1   :  { %v405_v0 = vld [vmem:[%s567_s1 + $0x40] sm:$0xff]   ;;  %v407_v2 = vld [vmem:[%s567_s1 + $0x48] sm:$0xff]   ;;  %v409_v4 = vld [vmem:[%s567_s1 + $0x50] sm:$0xff]   ;;  %v72_v16 = vunpack.c.l.s4 %v449_v15 }
   0x2   :  { %v406_v1 = vld [vmem:[%s567_s1] sm:$0xff]   ;;  %362 = vmatprep.subr.bf16.mxu0 %v405_v0  ;;  %v408_v3 = vld [vmem:[%s567_s1 + $0x8] sm:$0xff]   ;;  %v410_v5 = vld [vmem:[%s567_s1 + $0x10] sm:$0xff]   ;;  %v75_v12 = vshrl.u32 %v74_v8, 7 }
   0x3   :  { %363 = vmatpush3.bf16.msra.mxu0 %v406_v1  ;;  %v411_v6 = vld [vmem:[%s567_s1 + $0x58] sm:$0xff]   ;;  %v413_v9 = vld [vmem:[%s567_s1 + $0x60] sm:$0xff]   ;;  %v415_v11 = vld [vmem:[%s567_s1 + $0x68] sm:$0xff]   ;;  %v73_v18 = vunpack.c.0.s8 %v72_v16 }
   0x4   :  { %364 = vmatprep.subr.bf16.mxu0 %v407_v2  ;;  %v412_v7 = vld [vmem:[%s567_s1 + $0x18] sm:$0xff]   ;;  %v414_v10 = vld [vmem:[%s567_s1 + $0x20] sm:$0xff]   ;;  %v416_v14 = vld [vmem:[%s567_s1 + $0x28] sm:$0xff]  }
   0x5   :  { %v338_v13 = vld.sshfl [vmem:[%s566_s0] sm:$0x11 pattern:$0x75316420] }
   0x6   :  { %v70_v17 = vcombine.high %v338_v13, %v338_v13 }
   0x7   :  { %365 = vmatpush3.bf16.msra.mxu0 %v408_v3 }
   0x8   :  { %366 = vmatprep.subr.bf16.mxu0 %v409_v4 }
   0xb   :  { %367 = vmatpush3.bf16.msra.mxu0 %v410_v5 }
   0xc   :  { %368 = vmatprep.subr.bf16.mxu0 %v411_v6 }
   0xf   :  { %369 = vmatpush3.bf16.msra.mxu0 %v412_v7 }
  0x10   :  { %370 = vmatprep.subr.bf16.mxu0 %v413_v9 }
  0x13   :  { %371 = vmatpush3.bf16.msra.mxu0 %v414_v10 }
  0x14   :  { %10 = vsyncpa [#allocation4], 0  ;;  %372 = vmatprep.subr.bf16.mxu0 %v415_v11  ;;  %v417_v19 = vld [vmem:[%s567_s1 + $0x70] sm:$0xff]   ;;  %v76_v20 = vsub.s32 %v73_v18, %v75_v12  ;;  %v419_v23 = vld [vmem:[%s567_s1 + $0x78] sm:$0xff]   ;;  %vm26_vm0 = vcmask 517120   ;;  %v450_v26 = vmov 0.0  }
  0x15   :  { %v418_v21 = vld [vmem:[%s567_s1 + $0x30] sm:$0xff]   ;;  %v420_v24 = vld [vmem:[%s567_s1 + $0x38] sm:$0xff]   ;;  %27 = vst.msk [vmem:[#allocation2] sm:$0x3] %vm26_vm0, %v450_v26  ;;  %389 = vmatprep.subr.bf16.mxu1 %v450_v26  ;;  %v421_v27 = vld [vmem:[%s569_s3] sm:$0xff]   ;;  %vm451_vm1 = vmmov 0  }
  0x16   :  { %v84_v22 = vrot.slane %v70_v17, %v76_v20  ;;  %v77_v25 = vrot.slane %v338_v13, %v76_v20  ;;  %390 = vmatpush3.bf16.msra.mxu1 %v421_v27  ;;  %v422_v28 = vld [vmem:[%s569_s3 + $0x8] sm:$0xff]   ;;  %397 = vmatprep.mubr.msk.bf16.mxu1 %vm451_vm1, %v450_v26  ;;  %v423_v29 = vld [vmem:[%s569_s3 + $0x10] sm:$0xff]   ;;  %v424_v30 = vld [vmem:[%s569_s3 + $0x18] sm:$0xff]   ;;  %vm279_vm2 = vcmask 523264   ;;  %s452_s11 = smov [#allocation3]  }
  0x17   :  { %373 = vmatpush3.bf16.msra.mxu0 %v416_v14  ;;  %391 = vmatprep.subr.bf16.mxu1 %v450_v26  ;;  %v355_v38 = vld [vmem:[%s568_s2] ss:$0 sm:$0xff]  ;;  %s330_s12 = sshll.u32 %s452_s11, 4  ;;  %s331_s12 = int_to_ptr.vmem [resolvable:$true] %s330_s12 }
  0x18   :  { %374 = vmatprep.subr.bf16.mxu0 %v417_v19  ;;  %215 = vmatprep.mubr.bf16.mxu0 %v84_v22  ;;  %v356_v43 = vld [vmem:[%s570_s4] ss:$0 sm:$0xff]  ;;  %s425_s2 = scalar_lea.vmem %s331_s12, 32  ;;  %p430_p1 = scmp.lt.s32.totalorder %s331_s12, %s331_s12 }
  0x19   :  { %p426_p0 = scmp.ne.s32.totalorder %s331_s12, %s425_s2  ;;  %p431_p2 = scmp.lt.s32.totalorder %s425_s2, %s425_s2 }
  0x1a   :  { %392 = vmatpush3.bf16.msra.mxu1 %v422_v28 }
  0x1b   :  { %375 = vmatpush3.bf16.msra.mxu0 %v418_v21  ;;  %393 = vmatprep.subr.bf16.mxu1 %v450_v26  ;;  %p432_p3 = por %p431_p2, %p430_p1 }
  0x1c   :  { %376 = vmatprep.subr.bf16.mxu0 %v419_v23  ;;  %v28_v32 = vld [vmem:[#allocation2] sm:$0x3] }
  0x1d   :  { %p433_p4 = pnand %p432_p3, %p426_p0 }
  0x1e   :  { %394 = vmatpush3.bf16.msra.mxu1 %v423_v29 }
  0x1f   :  { %377 = vmatpush3.bf16.msra.mxu0 %v420_v24  ;;  %395 = vmatprep.subr.bf16.mxu1 %v450_v26 }
  0x22   :  { %216 = vmatmul.mubr.bf16.vlgmr.msra.gmra.mrb[0].mxu0 %v77_v25  ;;  %396 = vmatpush3.bf16.msra.mxu1 %v424_v30 }
  0xf5   :  { %v378_v31 = vpop.f32.mrb[0].mxu0 }
  0xf6   :  { %v379_v33 = vpop.f32.mrb[1].mxu0 }
  0xf7   :  { %v380_v34 = vadd.f32 %v379_v33, %v378_v31  ;;  %v381_v35 = vpop.f32.mrb[2].mxu0 }
  0xf8   :  { %v382_v36 = vpop.f32.mrb[3].mxu0 }
  0xf9   :  { %v223_v37 = vadd.f32 %v380_v34, %v28_v32 }
  0xfb   :  { %225 = vst.msk [vmem:[#allocation2] sm:$0x3] %vm26_vm0, %v223_v37 }
 0x102   :  { %v229_v39 = vld [vmem:[#allocation2] sm:$0x3] }
 0x103   :  { %v237_v40 = vadd.f32 %v355_v38, %v229_v39 }
 0x105   :  { %v238_v41 = vmax.f32 %v237_v40, 0.0 }
 0x107   :  { %v239_v42 = vpack.c.bf16 %v238_v41, %v238_v41 }
 0x109   :  { %398 = vmatmul.mubr.msk.bf16.vlgmr.msra.gmra.mrb[0].mxu1 %vm279_vm2, %v239_v42 }
 0x1dc   :  { %v317_v44 = vpop.f32.mrb[0].mxu1 }
 0x1dd   :  { %v318_v45 = vadd.f32 %v356_v43, %v317_v44  ;;  %v399_v46 = vpop.f32.mrb[1].mxu1 }
 0x1de   :  { %v320_v47 = vpop.f32.mrb[2].mxu1 }
 0x1df   :  { %323 = vst [vmem:[#allocation3] sm:$0x3] %v318_v45  ;;  %v400_v48 = vpop.f32.mrb[3].mxu1 }
 0x1e0   :  { %436 = shalt.err (!%p433_p4)
}
 0x1e1   :  { %s437_s4 = scalar_lea.hbm %s571_s5, 32 }
 0x1e2   :  { %p438_p5 = scmp.ne.s32.totalorder %s571_s5, %s437_s4  ;;  %p441_p6 = scmp.lt.u32.totalorder %s437_s4, %s571_s5 }
 0x1e4   :  { %p443_p7 = pnand %p441_p6, %p438_p5 }
 0x1e6   :  { %446 = shalt.err (!%p443_p7)
}
 0x1e7   :  { %333 = dma.vmem_to_hbm [thread:$0]  %s331_s12, 32, %s571_s5, [#allocation4]  }
 0x1e8   :  { %447 = dma.done.wait [#allocation4], 32  }
 0x1e9   :  { %448 = vsyncadd [#allocation4], 4294967264 }
 0x1ea   :  { %337 = vsyncpa [#allocation4], 1 }

</bundles_post_ra>
